<compile_context>
chip_gen: v6e
topology: v6e:2x2x1
jax: 0.10.0
libtpu: 0.0.40
codegen_flags: <defaults>
</compile_context>

<pallas_src>
import functools

import jax
import jax.numpy as jnp
import numpy as np
from jax.experimental import pallas as pl
from jax.experimental.pallas import tpu as pltpu

_LANES = 128  # lane width of the per-block scalar output slots


def _multibox_loss_kernel(d_ref, conf_ref, tgt_ref, out_ref, *, neg_pos_ratio):
    # One block = R batch rows.  Anchors (A) are lane-dense everywhere.
    d = d_ref[0]        # (R, 4, A) f32 : loc - loc_target
    conf = conf_ref[0]  # (R, C, A) f32
    tgt = tgt_ref[0]    # (R, A)    i32
    R, C, A = conf.shape

    pos = tgt > 0                                                 # (R, A)
    posf = pos.astype(jnp.float32)
    n_pos = jnp.sum(pos.astype(jnp.int32), axis=1, keepdims=True)  # (R, 1)

    # ---- localization loss: smooth L1 over positive anchors, summed ----
    ad = jnp.abs(d)
    sl1 = jnp.where(ad < 1.0, 0.5 * d * d, ad - 0.5)              # (R, 4, A)
    loss_loc = jnp.sum(jnp.sum(sl1, axis=1) * posf)               # scalar

    # ---- per-anchor cross entropy (classes on sublanes, anchors on lanes) ----
    cls_iota = jax.lax.broadcasted_iota(jnp.int32, (R, C, A), 1)
    tgt_logit = jnp.sum(jnp.where(cls_iota == tgt[:, None, :], conf, 0.0),
                        axis=1)                                   # (R, A)
    x_max = jnp.max(conf, axis=1)                                 # (R, A)
    expsum = jnp.sum(jnp.exp(conf - x_max[:, None, :]), axis=1)   # (R, A)
    ce = jnp.log(expsum) + x_max - tgt_logit                      # (R, A), >= 0
    loss_c = jnp.where(pos, 0.0, ce)                              # (R, A), >= 0

    # ---- hard-negative mining: per-row sum of the top-k values of loss_c ----
    k = jnp.minimum(neg_pos_ratio * n_pos, A - 1)                 # (R, 1) i32

    # Bit-level binary search for the k-th largest loss_c per row (exact:
    # loss_c >= 0, so its int32 bit pattern is monotone in the float value).
    # Each pass: VPU lane-tile partial counts + one small cross-lane reduce
    # per row.  `bits` is computed once, outside the loop.
    bits = pltpu.bitcast(loss_c, jnp.int32)                       # (R, A)
    prefix = jnp.zeros((R, 1), jnp.int32)
    for b in range(30, -1, -1):                                   # 31 passes
        cand = prefix | jnp.int32(1 << b)
        cnt = jnp.sum((bits >= cand).astype(jnp.int32), axis=1, keepdims=True)
        prefix = jnp.where(cnt >= k, cand, prefix)
    # For k >= 1, `prefix` is exactly the bit pattern of the k-th largest value.
    thresh = jnp.max(jnp.where(bits == prefix, loss_c, 0.0),
                     axis=1, keepdims=True)                       # (R, 1)
    gt = loss_c > thresh
    cnt_gt = jnp.sum(gt.astype(jnp.int32), axis=1, keepdims=True)
    sum_gt = jnp.sum(jnp.where(gt, loss_c, 0.0), axis=1, keepdims=True)
    topk_sum = sum_gt + (k - cnt_gt).astype(jnp.float32) * thresh
    topk_sum = jnp.where(k > 0, topk_sum, 0.0)                    # rows w/o positives

    # Tie handling is irrelevant for the *sum*: any size-k set consistent with
    # a descending sort has the same value multiset, so this equals the
    # reference's sum of ce over (pos | hard-negatives).
    pos_ce = jnp.sum(jnp.where(pos, ce, 0.0), axis=1, keepdims=True)
    loss_conf = jnp.sum(pos_ce + topk_sum)                        # block scalar
    n_pos_f = jnp.sum(n_pos).astype(jnp.float32)                  # block scalar

    # Single lane-dense output block per grid step:
    #   lanes [0,128) = loss_conf, [128,256) = loss_loc, [256,384) = n_pos.
    lane = jax.lax.broadcasted_iota(jnp.int32, (1, 1, 3 * _LANES), 2)
    out_ref[...] = jnp.where(lane < _LANES, loss_conf,
                             jnp.where(lane < 2 * _LANES, loss_loc, n_pos_f))


def multibox_loss(loc, conf, loc_target, conf_target, *, neg_pos_ratio=3):
    """Returns (loss_conf, loss_loc, loss_total) as f32 scalars."""
    B, A, C = conf.shape

    # Rows per grid step: <= 8 (one full sublane group), but keep the grid
    # length >= 2 so both v7x TensorCores get work on the "parallel" axis.
    R = max(1, min(8, B // 2)) if B >= 2 else 1
    G = (B + R - 1) // R
    B_pad = G * R
    pad = B_pad - B

    # Fold loc - loc_target in the wrapper: smooth-L1 only needs the
    # difference, so only one transposed localization stream reaches HBM.
    d = loc.astype(jnp.float32) - loc_target.astype(jnp.float32)
    d_t = jnp.transpose(d, (0, 2, 1))                            # (B, 4, A)
    conf_t = jnp.transpose(conf.astype(jnp.float32), (0, 2, 1))  # (B, C, A)
    tgt = conf_target.astype(jnp.int32)                          # (B, A)

    if pad:
        # Zero-padded rows: conf_target == 0 everywhere -> n_pos = 0,
        # num_neg = 0, no positives: exactly zero contribution to all sums.
        d_t = jnp.pad(d_t, ((0, pad), (0, 0), (0, 0)))
        conf_t = jnp.pad(conf_t, ((0, pad), (0, 0), (0, 0)))
        tgt = jnp.pad(tgt, ((0, pad), (0, 0)))

    # Free reshapes: split the (padded) batch into (grid, rows-per-block).
    d_t = d_t.reshape(G, R, 4, A)
    conf_t = conf_t.reshape(G, R, C, A)
    tgt = tgt.reshape(G, R, A)

    kernel = functools.partial(_multibox_loss_kernel,
                               neg_pos_ratio=neg_pos_ratio)

    block_in_bytes = 4 * R * A * (4 + C + 1)
    vmem_limit = int(min(64 * 2**20, max(32 * 2**20, 4 * block_in_bytes)))

    flops = B_pad * A * (6 * C + 4 * 31 + 60)
    transcendentals = B_pad * A * (C + 1)
    bytes_accessed = 4 * (B_pad * A * (4 + C + 1) + G * 3 * _LANES)

    out = pl.pallas_call(
        kernel,
        grid=(G,),
        out_shape=jax.ShapeDtypeStruct((G, 1, 3 * _LANES), jnp.float32),
        in_specs=[
            pl.BlockSpec((1, R, 4, A), lambda g: (g, 0, 0, 0)),  # loc - loc_target
            pl.BlockSpec((1, R, C, A), lambda g: (g, 0, 0, 0)),  # conf
            pl.BlockSpec((1, R, A), lambda g: (g, 0, 0)),        # conf_target
        ],
        out_specs=pl.BlockSpec((1, 1, 3 * _LANES), lambda g: (g, 0, 0)),
        compiler_params=pltpu.CompilerParams(
            dimension_semantics=("parallel",),
            vmem_limit_bytes=vmem_limit,
            # Let XLA fuse the wrapper's layout change / subtraction into the
            # pallas_call operands instead of a standalone HBM pass.
            allow_input_fusion=[True, True, True],
        ),
        cost_estimate=pl.CostEstimate(
            flops=flops,
            transcendentals=transcendentals,
            bytes_accessed=bytes_accessed),
    )(d_t, conf_t, tgt)

    # Tiny epilogue: combine per-block partials (whole-batch normalization by
    # the total positive count, like the PyTorch module; N == 0 -> inf/nan).
    part = out[:, 0, :]                                          # (G, 384)
    n_total = jnp.sum(part[:, 2 * _LANES])
    loss_conf = jnp.sum(part[:, 0]) / n_total
    loss_loc = jnp.sum(part[:, _LANES]) / n_total
    return loss_conf, loss_loc, loss_conf + loss_loc


def multibox_loss_ref(loc, conf, loc_target, conf_target, neg_pos_ratio=3):
    """Pure-JAX reference mirroring the PyTorch module (argsort-based mining)."""
    B, A, C = conf.shape
    pos = conf_target > 0
    n_pos = jnp.sum(pos.astype(jnp.int32), axis=1, keepdims=True)
    N = jnp.sum(n_pos).astype(jnp.float32)

    d = loc - loc_target
    ad = jnp.abs(d)
    sl1 = jnp.where(ad < 1.0, 0.5 * d * d, ad - 0.5)
    loss_loc = jnp.sum(jnp.where(pos[:, :, None], sl1, 0.0))

    tgt_logit = jnp.take_along_axis(conf, conf_target[:, :, None], axis=2)[:, :, 0]
    x_max = jnp.max(conf)                      # global max, like the reference
    lse = jnp.log(jnp.sum(jnp.exp(conf - x_max), axis=2)) + x_max
    ce = lse - tgt_logit
    loss_c = jnp.where(pos, 0.0, ce)

    loss_indices = jnp.argsort(-loss_c, axis=1)       # stable descending
    loss_rank = jnp.argsort(loss_indices, axis=1)
    num_neg = jnp.minimum(neg_pos_ratio * n_pos, A - 1)
    neg = loss_rank < num_neg

    mining = pos | neg
    loss_conf = jnp.sum(jnp.where(mining, ce, 0.0))
    return loss_conf / N, loss_loc / N, (loss_conf + loss_loc) / N


if __name__ == "__main__":
    NEG_POS_RATIO = 3

    def make_inputs(key, B, A, C, pos_frac=0.2):
        k1, k2, k3, k4, k5 = jax.random.split(key, 5)
        loc = jax.random.normal(k1, (B, A, 4), dtype=jnp.float32)
        conf = jax.random.normal(k2, (B, A, C), dtype=jnp.float32)
        loc_target = jax.random.normal(k3, (B, A, 4), dtype=jnp.float32)
        is_pos = jax.random.uniform(k4, (B, A)) < pos_frac
        pos_cls = jax.random.randint(k5, (B, A), 1, C)
        conf_target = jnp.where(is_pos, pos_cls, 0).astype(jnp.int32)
        return loc, conf, loc_target, conf_target

    def check(args):
        out = jax.block_until_ready(
            multibox_loss(*args, neg_pos_ratio=NEG_POS_RATIO))
        ref = multibox_loss_ref(*args, neg_pos_ratio=NEG_POS_RATIO)
        for got, want in zip(out, ref):
            np.testing.assert_allclose(np.asarray(got), np.asarray(want),
                                       rtol=1e-4, atol=1e-4)

    key = jax.random.PRNGKey(0)
    k_a, k_b = jax.random.split(key)

    # Case 1: B=8 -> R=4, grid=2 (both v7x cores busy).
    loc, conf, loc_t, tgt = make_inputs(k_a, 8, 256, 8)
    check((loc, conf, loc_t, tgt))

    # Case 2: same shapes, heavily tied losses (quantized logits) and one
    # batch row with zero positives (num_neg == 0 for that row).
    conf_q = jnp.round(conf * 2.0) / 2.0
    tgt2 = tgt.at[0].set(0)
    check((loc, conf_q, loc_t, tgt2))

    # Case 3: B=5 -> R=2, grid=3; the batch is zero-padded 5 -> 6 in-wrapper.
    loc, conf, loc_t, tgt = make_inputs(k_b, 5, 128, 6)
    check((loc, conf, loc_t, tgt))

    print("KERNEL_OK")
</pallas_src>

<mosaic_0001>
module attributes {stable_mosaic.version = 11 : i64} {
  func.func @_multibox_loss_kernel(%arg0: i32, %arg1: memref<1x4x4x256xf32, #tpu.memory_space<vmem>>, %arg2: memref<1x4x8x256xf32, #tpu.memory_space<vmem>>, %arg3: memref<1x4x256xi32, #tpu.memory_space<vmem>>, %arg4: memref<1x1x384xf32, #tpu.memory_space<vmem>>) attributes {dimension_semantics = [#tpu.dimension_semantics<parallel>], iteration_bounds = array<i64: 2>, scalar_prefetch = 0 : i64, scratch_operands = 0 : i64, tpu.core_type = #tpu.core_type<tc>, window_params = [{transform_indices = @transform_0, window_bounds = array<i64: 1, 4, 4, 256>}, {transform_indices = @transform_1, window_bounds = array<i64: 1, 4, 8, 256>}, {transform_indices = @transform_2, window_bounds = array<i64: 1, 4, 256>}, {transform_indices = @transform_3, window_bounds = array<i64: 1, 1, 384>}]} {
    %c0 = arith.constant 0 : index
    %c0_0 = arith.constant 0 : index
    %c0_1 = arith.constant 0 : index
    %c0_2 = arith.constant 0 : index
    %0 = vector.load %arg1[%c0, %c0_0, %c0_1, %c0_2] : memref<1x4x4x256xf32, #tpu.memory_space<vmem>>, vector<1x4x4x256xf32>
    %1 = vector.shape_cast %0 : vector<1x4x4x256xf32> to vector<4x4x256xf32>
    %c0_3 = arith.constant 0 : index
    %c0_4 = arith.constant 0 : index
    %c0_5 = arith.constant 0 : index
    %c0_6 = arith.constant 0 : index
    %2 = vector.load %arg2[%c0_3, %c0_4, %c0_5, %c0_6] : memref<1x4x8x256xf32, #tpu.memory_space<vmem>>, vector<1x4x8x256xf32>
    %3 = vector.shape_cast %2 : vector<1x4x8x256xf32> to vector<4x8x256xf32>
    %c0_7 = arith.constant 0 : index
    %c0_8 = arith.constant 0 : index
    %c0_9 = arith.constant 0 : index
    %4 = vector.load %arg3[%c0_7, %c0_8, %c0_9] : memref<1x4x256xi32, #tpu.memory_space<vmem>>, vector<1x4x256xi32>
    %5 = vector.shape_cast %4 : vector<1x4x256xi32> to vector<4x256xi32>
    %c0_i32 = arith.constant 0 : i32
    %6 = vector.broadcast %c0_i32 : i32 to vector<4x256xi32>
    %7 = arith.cmpi sgt, %5, %6 : vector<4x256xi32>
    %8 = arith.extui %7 : vector<4x256xi1> to vector<4x256xi32>
    %9 = arith.sitofp %8 : vector<4x256xi32> to vector<4x256xf32>
    %10 = arith.extui %7 : vector<4x256xi1> to vector<4x256xi32>
    %cst = arith.constant dense<0> : vector<4xi32>
    %11 = vector.multi_reduction <add>, %10, %cst [1] : vector<4x256xi32> to vector<4xi32>
    %12 = vector.shape_cast %11 : vector<4xi32> to vector<4x1xi32>
    %13 = math.absf %1 : vector<4x4x256xf32>
    %cst_10 = arith.constant 1.000000e+00 : f32
    %14 = vector.broadcast %cst_10 : f32 to vector<4x4x256xf32>
    %15 = arith.cmpf olt, %13, %14 : vector<4x4x256xf32>
    %cst_11 = arith.constant 5.000000e-01 : f32
    %16 = vector.broadcast %cst_11 : f32 to vector<4x4x256xf32>
    %17 = arith.mulf %16, %1 : vector<4x4x256xf32>
    %18 = arith.mulf %17, %1 : vector<4x4x256xf32>
    %cst_12 = arith.constant 5.000000e-01 : f32
    %19 = vector.broadcast %cst_12 : f32 to vector<4x4x256xf32>
    %20 = arith.subf %13, %19 : vector<4x4x256xf32>
    %21 = arith.select %15, %18, %20 : vector<4x4x256xi1>, vector<4x4x256xf32>
    %cst_13 = arith.constant dense<0.000000e+00> : vector<4x256xf32>
    %22 = vector.multi_reduction <add>, %21, %cst_13 [1] : vector<4x4x256xf32> to vector<4x256xf32>
    %23 = arith.mulf %22, %9 : vector<4x256xf32>
    %24 = vector.shape_cast %23 : vector<4x256xf32> to vector<1x4x256xf32>
    %cst_14 = arith.constant dense<0.000000e+00> : vector<1xf32>
    %25 = vector.multi_reduction <add>, %24, %cst_14 [1, 2] : vector<1x4x256xf32> to vector<1xf32>
    %26 = vector.shape_cast %25 : vector<1xf32> to vector<1x1x1xf32>
    %27 = vector.extract %26[0, 0, 0] : f32 from vector<1x1x1xf32>
    %28 = tpu.iota {dimensions = array<i32: 1>} : vector<4x8x256xi32>
    %29 = vector.shape_cast %5 : vector<4x256xi32> to vector<4x1x256xi32>
    %30 = vector.broadcast %29 : vector<4x1x256xi32> to vector<4x8x256xi32>
    %31 = arith.cmpi eq, %28, %30 : vector<4x8x256xi32>
    %cst_15 = arith.constant 0.000000e+00 : f32
    %32 = vector.broadcast %cst_15 : f32 to vector<4x8x256xf32>
    %33 = arith.select %31, %3, %32 : vector<4x8x256xi1>, vector<4x8x256xf32>
    %cst_16 = arith.constant dense<0.000000e+00> : vector<4x256xf32>
    %34 = vector.multi_reduction <add>, %33, %cst_16 [1] : vector<4x8x256xf32> to vector<4x256xf32>
    %cst_17 = arith.constant dense<0xFF800000> : vector<4x256xf32>
    %35 = vector.multi_reduction <maximumf>, %3, %cst_17 [1] : vector<4x8x256xf32> to vector<4x256xf32>
    %36 = vector.shape_cast %35 : vector<4x256xf32> to vector<4x1x256xf32>
    %37 = vector.broadcast %36 : vector<4x1x256xf32> to vector<4x8x256xf32>
    %38 = arith.subf %3, %37 : vector<4x8x256xf32>
    %39 = math.exp %38 : vector<4x8x256xf32>
    %cst_18 = arith.constant dense<0.000000e+00> : vector<4x256xf32>
    %40 = vector.multi_reduction <add>, %39, %cst_18 [1] : vector<4x8x256xf32> to vector<4x256xf32>
    %41 = math.log %40 : vector<4x256xf32>
    %42 = arith.addf %41, %35 : vector<4x256xf32>
    %43 = arith.subf %42, %34 : vector<4x256xf32>
    %cst_19 = arith.constant 0.000000e+00 : f32
    %44 = vector.broadcast %cst_19 : f32 to vector<4x256xf32>
    %45 = arith.select %7, %44, %43 : vector<4x256xi1>, vector<4x256xf32>
    %c3_i32 = arith.constant 3 : i32
    %46 = vector.broadcast %c3_i32 : i32 to vector<4x1xi32>
    %47 = arith.muli %46, %12 : vector<4x1xi32>
    %c255_i32 = arith.constant 255 : i32
    %48 = vector.broadcast %c255_i32 : i32 to vector<4x1xi32>
    %49 = arith.minsi %47, %48 : vector<4x1xi32>
    %50 = tpu.bitcast %45 : vector<4x256xf32> -> vector<4x256xi32>
    %c0_i32_20 = arith.constant 0 : i32
    %51 = vector.broadcast %c0_i32_20 : i32 to vector<4x1xi32>
    %c1073741824_i32 = arith.constant 1073741824 : i32
    %52 = vector.broadcast %c1073741824_i32 : i32 to vector<4x1xi32>
    %53 = arith.ori %51, %52 : vector<4x1xi32>
    %54 = vector.broadcast %53 : vector<4x1xi32> to vector<4x256xi32>
    %55 = arith.cmpi sge, %50, %54 : vector<4x256xi32>
    %56 = arith.extui %55 : vector<4x256xi1> to vector<4x256xi32>
    %cst_21 = arith.constant dense<0> : vector<4xi32>
    %57 = vector.multi_reduction <add>, %56, %cst_21 [1] : vector<4x256xi32> to vector<4xi32>
    %58 = vector.shape_cast %57 : vector<4xi32> to vector<4x1xi32>
    %59 = arith.cmpi sge, %58, %49 : vector<4x1xi32>
    %60 = arith.select %59, %53, %51 : vector<4x1xi1>, vector<4x1xi32>
    %c536870912_i32 = arith.constant 536870912 : i32
    %61 = vector.broadcast %c536870912_i32 : i32 to vector<4x1xi32>
    %62 = arith.ori %60, %61 : vector<4x1xi32>
    %63 = vector.broadcast %62 : vector<4x1xi32> to vector<4x256xi32>
    %64 = arith.cmpi sge, %50, %63 : vector<4x256xi32>
    %65 = arith.extui %64 : vector<4x256xi1> to vector<4x256xi32>
    %cst_22 = arith.constant dense<0> : vector<4xi32>
    %66 = vector.multi_reduction <add>, %65, %cst_22 [1] : vector<4x256xi32> to vector<4xi32>
    %67 = vector.shape_cast %66 : vector<4xi32> to vector<4x1xi32>
    %68 = arith.cmpi sge, %67, %49 : vector<4x1xi32>
    %69 = arith.select %68, %62, %60 : vector<4x1xi1>, vector<4x1xi32>
    %c268435456_i32 = arith.constant 268435456 : i32
    %70 = vector.broadcast %c268435456_i32 : i32 to vector<4x1xi32>
    %71 = arith.ori %69, %70 : vector<4x1xi32>
    %72 = vector.broadcast %71 : vector<4x1xi32> to vector<4x256xi32>
    %73 = arith.cmpi sge, %50, %72 : vector<4x256xi32>
    %74 = arith.extui %73 : vector<4x256xi1> to vector<4x256xi32>
    %cst_23 = arith.constant dense<0> : vector<4xi32>
    %75 = vector.multi_reduction <add>, %74, %cst_23 [1] : vector<4x256xi32> to vector<4xi32>
    %76 = vector.shape_cast %75 : vector<4xi32> to vector<4x1xi32>
    %77 = arith.cmpi sge, %76, %49 : vector<4x1xi32>
    %78 = arith.select %77, %71, %69 : vector<4x1xi1>, vector<4x1xi32>
    %c134217728_i32 = arith.constant 134217728 : i32
    %79 = vector.broadcast %c134217728_i32 : i32 to vector<4x1xi32>
    %80 = arith.ori %78, %79 : vector<4x1xi32>
    %81 = vector.broadcast %80 : vector<4x1xi32> to vector<4x256xi32>
    %82 = arith.cmpi sge, %50, %81 : vector<4x256xi32>
    %83 = arith.extui %82 : vector<4x256xi1> to vector<4x256xi32>
    %cst_24 = arith.constant dense<0> : vector<4xi32>
    %84 = vector.multi_reduction <add>, %83, %cst_24 [1] : vector<4x256xi32> to vector<4xi32>
    %85 = vector.shape_cast %84 : vector<4xi32> to vector<4x1xi32>
    %86 = arith.cmpi sge, %85, %49 : vector<4x1xi32>
    %87 = arith.select %86, %80, %78 : vector<4x1xi1>, vector<4x1xi32>
    %c67108864_i32 = arith.constant 67108864 : i32
    %88 = vector.broadcast %c67108864_i32 : i32 to vector<4x1xi32>
    %89 = arith.ori %87, %88 : vector<4x1xi32>
    %90 = vector.broadcast %89 : vector<4x1xi32> to vector<4x256xi32>
    %91 = arith.cmpi sge, %50, %90 : vector<4x256xi32>
    %92 = arith.extui %91 : vector<4x256xi1> to vector<4x256xi32>
    %cst_25 = arith.constant dense<0> : vector<4xi32>
    %93 = vector.multi_reduction <add>, %92, %cst_25 [1] : vector<4x256xi32> to vector<4xi32>
    %94 = vector.shape_cast %93 : vector<4xi32> to vector<4x1xi32>
    %95 = arith.cmpi sge, %94, %49 : vector<4x1xi32>
    %96 = arith.select %95, %89, %87 : vector<4x1xi1>, vector<4x1xi32>
    %c33554432_i32 = arith.constant 33554432 : i32
    %97 = vector.broadcast %c33554432_i32 : i32 to vector<4x1xi32>
    %98 = arith.ori %96, %97 : vector<4x1xi32>
    %99 = vector.broadcast %98 : vector<4x1xi32> to vector<4x256xi32>
    %100 = arith.cmpi sge, %50, %99 : vector<4x256xi32>
    %101 = arith.extui %100 : vector<4x256xi1> to vector<4x256xi32>
    %cst_26 = arith.constant dense<0> : vector<4xi32>
    %102 = vector.multi_reduction <add>, %101, %cst_26 [1] : vector<4x256xi32> to vector<4xi32>
    %103 = vector.shape_cast %102 : vector<4xi32> to vector<4x1xi32>
    %104 = arith.cmpi sge, %103, %49 : vector<4x1xi32>
    %105 = arith.select %104, %98, %96 : vector<4x1xi1>, vector<4x1xi32>
    %c16777216_i32 = arith.constant 16777216 : i32
    %106 = vector.broadcast %c16777216_i32 : i32 to vector<4x1xi32>
    %107 = arith.ori %105, %106 : vector<4x1xi32>
    %108 = vector.broadcast %107 : vector<4x1xi32> to vector<4x256xi32>
    %109 = arith.cmpi sge, %50, %108 : vector<4x256xi32>
    %110 = arith.extui %109 : vector<4x256xi1> to vector<4x256xi32>
    %cst_27 = arith.constant dense<0> : vector<4xi32>
    %111 = vector.multi_reduction <add>, %110, %cst_27 [1] : vector<4x256xi32> to vector<4xi32>
    %112 = vector.shape_cast %111 : vector<4xi32> to vector<4x1xi32>
    %113 = arith.cmpi sge, %112, %49 : vector<4x1xi32>
    %114 = arith.select %113, %107, %105 : vector<4x1xi1>, vector<4x1xi32>
    %c8388608_i32 = arith.constant 8388608 : i32
    %115 = vector.broadcast %c8388608_i32 : i32 to vector<4x1xi32>
    %116 = arith.ori %114, %115 : vector<4x1xi32>
    %117 = vector.broadcast %116 : vector<4x1xi32> to vector<4x256xi32>
    %118 = arith.cmpi sge, %50, %117 : vector<4x256xi32>
    %119 = arith.extui %118 : vector<4x256xi1> to vector<4x256xi32>
    %cst_28 = arith.constant dense<0> : vector<4xi32>
    %120 = vector.multi_reduction <add>, %119, %cst_28 [1] : vector<4x256xi32> to vector<4xi32>
    %121 = vector.shape_cast %120 : vector<4xi32> to vector<4x1xi32>
    %122 = arith.cmpi sge, %121, %49 : vector<4x1xi32>
    %123 = arith.select %122, %116, %114 : vector<4x1xi1>, vector<4x1xi32>
    %c4194304_i32 = arith.constant 4194304 : i32
    %124 = vector.broadcast %c4194304_i32 : i32 to vector<4x1xi32>
    %125 = arith.ori %123, %124 : vector<4x1xi32>
    %126 = vector.broadcast %125 : vector<4x1xi32> to vector<4x256xi32>
    %127 = arith.cmpi sge, %50, %126 : vector<4x256xi32>
    %128 = arith.extui %127 : vector<4x256xi1> to vector<4x256xi32>
    %cst_29 = arith.constant dense<0> : vector<4xi32>
    %129 = vector.multi_reduction <add>, %128, %cst_29 [1] : vector<4x256xi32> to vector<4xi32>
    %130 = vector.shape_cast %129 : vector<4xi32> to vector<4x1xi32>
    %131 = arith.cmpi sge, %130, %49 : vector<4x1xi32>
    %132 = arith.select %131, %125, %123 : vector<4x1xi1>, vector<4x1xi32>
    %c2097152_i32 = arith.constant 2097152 : i32
    %133 = vector.broadcast %c2097152_i32 : i32 to vector<4x1xi32>
    %134 = arith.ori %132, %133 : vector<4x1xi32>
    %135 = vector.broadcast %134 : vector<4x1xi32> to vector<4x256xi32>
    %136 = arith.cmpi sge, %50, %135 : vector<4x256xi32>
    %137 = arith.extui %136 : vector<4x256xi1> to vector<4x256xi32>
    %cst_30 = arith.constant dense<0> : vector<4xi32>
    %138 = vector.multi_reduction <add>, %137, %cst_30 [1] : vector<4x256xi32> to vector<4xi32>
    %139 = vector.shape_cast %138 : vector<4xi32> to vector<4x1xi32>
    %140 = arith.cmpi sge, %139, %49 : vector<4x1xi32>
    %141 = arith.select %140, %134, %132 : vector<4x1xi1>, vector<4x1xi32>
    %c1048576_i32 = arith.constant 1048576 : i32
    %142 = vector.broadcast %c1048576_i32 : i32 to vector<4x1xi32>
    %143 = arith.ori %141, %142 : vector<4x1xi32>
    %144 = vector.broadcast %143 : vector<4x1xi32> to vector<4x256xi32>
    %145 = arith.cmpi sge, %50, %144 : vector<4x256xi32>
    %146 = arith.extui %145 : vector<4x256xi1> to vector<4x256xi32>
    %cst_31 = arith.constant dense<0> : vector<4xi32>
    %147 = vector.multi_reduction <add>, %146, %cst_31 [1] : vector<4x256xi32> to vector<4xi32>
    %148 = vector.shape_cast %147 : vector<4xi32> to vector<4x1xi32>
    %149 = arith.cmpi sge, %148, %49 : vector<4x1xi32>
    %150 = arith.select %149, %143, %141 : vector<4x1xi1>, vector<4x1xi32>
    %c524288_i32 = arith.constant 524288 : i32
    %151 = vector.broadcast %c524288_i32 : i32 to vector<4x1xi32>
    %152 = arith.ori %150, %151 : vector<4x1xi32>
    %153 = vector.broadcast %152 : vector<4x1xi32> to vector<4x256xi32>
    %154 = arith.cmpi sge, %50, %153 : vector<4x256xi32>
    %155 = arith.extui %154 : vector<4x256xi1> to vector<4x256xi32>
    %cst_32 = arith.constant dense<0> : vector<4xi32>
    %156 = vector.multi_reduction <add>, %155, %cst_32 [1] : vector<4x256xi32> to vector<4xi32>
    %157 = vector.shape_cast %156 : vector<4xi32> to vector<4x1xi32>
    %158 = arith.cmpi sge, %157, %49 : vector<4x1xi32>
    %159 = arith.select %158, %152, %150 : vector<4x1xi1>, vector<4x1xi32>
    %c262144_i32 = arith.constant 262144 : i32
    %160 = vector.broadcast %c262144_i32 : i32 to vector<4x1xi32>
    %161 = arith.ori %159, %160 : vector<4x1xi32>
    %162 = vector.broadcast %161 : vector<4x1xi32> to vector<4x256xi32>
    %163 = arith.cmpi sge, %50, %162 : vector<4x256xi32>
    %164 = arith.extui %163 : vector<4x256xi1> to vector<4x256xi32>
    %cst_33 = arith.constant dense<0> : vector<4xi32>
    %165 = vector.multi_reduction <add>, %164, %cst_33 [1] : vector<4x256xi32> to vector<4xi32>
    %166 = vector.shape_cast %165 : vector<4xi32> to vector<4x1xi32>
    %167 = arith.cmpi sge, %166, %49 : vector<4x1xi32>
    %168 = arith.select %167, %161, %159 : vector<4x1xi1>, vector<4x1xi32>
    %c131072_i32 = arith.constant 131072 : i32
    %169 = vector.broadcast %c131072_i32 : i32 to vector<4x1xi32>
    %170 = arith.ori %168, %169 : vector<4x1xi32>
    %171 = vector.broadcast %170 : vector<4x1xi32> to vector<4x256xi32>
    %172 = arith.cmpi sge, %50, %171 : vector<4x256xi32>
    %173 = arith.extui %172 : vector<4x256xi1> to vector<4x256xi32>
    %cst_34 = arith.constant dense<0> : vector<4xi32>
    %174 = vector.multi_reduction <add>, %173, %cst_34 [1] : vector<4x256xi32> to vector<4xi32>
    %175 = vector.shape_cast %174 : vector<4xi32> to vector<4x1xi32>
    %176 = arith.cmpi sge, %175, %49 : vector<4x1xi32>
    %177 = arith.select %176, %170, %168 : vector<4x1xi1>, vector<4x1xi32>
    %c65536_i32 = arith.constant 65536 : i32
    %178 = vector.broadcast %c65536_i32 : i32 to vector<4x1xi32>
    %179 = arith.ori %177, %178 : vector<4x1xi32>
    %180 = vector.broadcast %179 : vector<4x1xi32> to vector<4x256xi32>
    %181 = arith.cmpi sge, %50, %180 : vector<4x256xi32>
    %182 = arith.extui %181 : vector<4x256xi1> to vector<4x256xi32>
    %cst_35 = arith.constant dense<0> : vector<4xi32>
    %183 = vector.multi_reduction <add>, %182, %cst_35 [1] : vector<4x256xi32> to vector<4xi32>
    %184 = vector.shape_cast %183 : vector<4xi32> to vector<4x1xi32>
    %185 = arith.cmpi sge, %184, %49 : vector<4x1xi32>
    %186 = arith.select %185, %179, %177 : vector<4x1xi1>, vector<4x1xi32>
    %c32768_i32 = arith.constant 32768 : i32
    %187 = vector.broadcast %c32768_i32 : i32 to vector<4x1xi32>
    %188 = arith.ori %186, %187 : vector<4x1xi32>
    %189 = vector.broadcast %188 : vector<4x1xi32> to vector<4x256xi32>
    %190 = arith.cmpi sge, %50, %189 : vector<4x256xi32>
    %191 = arith.extui %190 : vector<4x256xi1> to vector<4x256xi32>
    %cst_36 = arith.constant dense<0> : vector<4xi32>
    %192 = vector.multi_reduction <add>, %191, %cst_36 [1] : vector<4x256xi32> to vector<4xi32>
    %193 = vector.shape_cast %192 : vector<4xi32> to vector<4x1xi32>
    %194 = arith.cmpi sge, %193, %49 : vector<4x1xi32>
    %195 = arith.select %194, %188, %186 : vector<4x1xi1>, vector<4x1xi32>
    %c16384_i32 = arith.constant 16384 : i32
    %196 = vector.broadcast %c16384_i32 : i32 to vector<4x1xi32>
    %197 = arith.ori %195, %196 : vector<4x1xi32>
    %198 = vector.broadcast %197 : vector<4x1xi32> to vector<4x256xi32>
    %199 = arith.cmpi sge, %50, %198 : vector<4x256xi32>
    %200 = arith.extui %199 : vector<4x256xi1> to vector<4x256xi32>
    %cst_37 = arith.constant dense<0> : vector<4xi32>
    %201 = vector.multi_reduction <add>, %200, %cst_37 [1] : vector<4x256xi32> to vector<4xi32>
    %202 = vector.shape_cast %201 : vector<4xi32> to vector<4x1xi32>
    %203 = arith.cmpi sge, %202, %49 : vector<4x1xi32>
    %204 = arith.select %203, %197, %195 : vector<4x1xi1>, vector<4x1xi32>
    %c8192_i32 = arith.constant 8192 : i32
    %205 = vector.broadcast %c8192_i32 : i32 to vector<4x1xi32>
    %206 = arith.ori %204, %205 : vector<4x1xi32>
    %207 = vector.broadcast %206 : vector<4x1xi32> to vector<4x256xi32>
    %208 = arith.cmpi sge, %50, %207 : vector<4x256xi32>
    %209 = arith.extui %208 : vector<4x256xi1> to vector<4x256xi32>
    %cst_38 = arith.constant dense<0> : vector<4xi32>
    %210 = vector.multi_reduction <add>, %209, %cst_38 [1] : vector<4x256xi32> to vector<4xi32>
    %211 = vector.shape_cast %210 : vector<4xi32> to vector<4x1xi32>
    %212 = arith.cmpi sge, %211, %49 : vector<4x1xi32>
    %213 = arith.select %212, %206, %204 : vector<4x1xi1>, vector<4x1xi32>
    %c4096_i32 = arith.constant 4096 : i32
    %214 = vector.broadcast %c4096_i32 : i32 to vector<4x1xi32>
    %215 = arith.ori %213, %214 : vector<4x1xi32>
    %216 = vector.broadcast %215 : vector<4x1xi32> to vector<4x256xi32>
    %217 = arith.cmpi sge, %50, %216 : vector<4x256xi32>
    %218 = arith.extui %217 : vector<4x256xi1> to vector<4x256xi32>
    %cst_39 = arith.constant dense<0> : vector<4xi32>
    %219 = vector.multi_reduction <add>, %218, %cst_39 [1] : vector<4x256xi32> to vector<4xi32>
    %220 = vector.shape_cast %219 : vector<4xi32> to vector<4x1xi32>
    %221 = arith.cmpi sge, %220, %49 : vector<4x1xi32>
    %222 = arith.select %221, %215, %213 : vector<4x1xi1>, vector<4x1xi32>
    %c2048_i32 = arith.constant 2048 : i32
    %223 = vector.broadcast %c2048_i32 : i32 to vector<4x1xi32>
    %224 = arith.ori %222, %223 : vector<4x1xi32>
    %225 = vector.broadcast %224 : vector<4x1xi32> to vector<4x256xi32>
    %226 = arith.cmpi sge, %50, %225 : vector<4x256xi32>
    %227 = arith.extui %226 : vector<4x256xi1> to vector<4x256xi32>
    %cst_40 = arith.constant dense<0> : vector<4xi32>
    %228 = vector.multi_reduction <add>, %227, %cst_40 [1] : vector<4x256xi32> to vector<4xi32>
    %229 = vector.shape_cast %228 : vector<4xi32> to vector<4x1xi32>
    %230 = arith.cmpi sge, %229, %49 : vector<4x1xi32>
    %231 = arith.select %230, %224, %222 : vector<4x1xi1>, vector<4x1xi32>
    %c1024_i32 = arith.constant 1024 : i32
    %232 = vector.broadcast %c1024_i32 : i32 to vector<4x1xi32>
    %233 = arith.ori %231, %232 : vector<4x1xi32>
    %234 = vector.broadcast %233 : vector<4x1xi32> to vector<4x256xi32>
    %235 = arith.cmpi sge, %50, %234 : vector<4x256xi32>
    %236 = arith.extui %235 : vector<4x256xi1> to vector<4x256xi32>
    %cst_41 = arith.constant dense<0> : vector<4xi32>
    %237 = vector.multi_reduction <add>, %236, %cst_41 [1] : vector<4x256xi32> to vector<4xi32>
    %238 = vector.shape_cast %237 : vector<4xi32> to vector<4x1xi32>
    %239 = arith.cmpi sge, %238, %49 : vector<4x1xi32>
    %240 = arith.select %239, %233, %231 : vector<4x1xi1>, vector<4x1xi32>
    %c512_i32 = arith.constant 512 : i32
    %241 = vector.broadcast %c512_i32 : i32 to vector<4x1xi32>
    %242 = arith.ori %240, %241 : vector<4x1xi32>
    %243 = vector.broadcast %242 : vector<4x1xi32> to vector<4x256xi32>
    %244 = arith.cmpi sge, %50, %243 : vector<4x256xi32>
    %245 = arith.extui %244 : vector<4x256xi1> to vector<4x256xi32>
    %cst_42 = arith.constant dense<0> : vector<4xi32>
    %246 = vector.multi_reduction <add>, %245, %cst_42 [1] : vector<4x256xi32> to vector<4xi32>
    %247 = vector.shape_cast %246 : vector<4xi32> to vector<4x1xi32>
    %248 = arith.cmpi sge, %247, %49 : vector<4x1xi32>
    %249 = arith.select %248, %242, %240 : vector<4x1xi1>, vector<4x1xi32>
    %c256_i32 = arith.constant 256 : i32
    %250 = vector.broadcast %c256_i32 : i32 to vector<4x1xi32>
    %251 = arith.ori %249, %250 : vector<4x1xi32>
    %252 = vector.broadcast %251 : vector<4x1xi32> to vector<4x256xi32>
    %253 = arith.cmpi sge, %50, %252 : vector<4x256xi32>
    %254 = arith.extui %253 : vector<4x256xi1> to vector<4x256xi32>
    %cst_43 = arith.constant dense<0> : vector<4xi32>
    %255 = vector.multi_reduction <add>, %254, %cst_43 [1] : vector<4x256xi32> to vector<4xi32>
    %256 = vector.shape_cast %255 : vector<4xi32> to vector<4x1xi32>
    %257 = arith.cmpi sge, %256, %49 : vector<4x1xi32>
    %258 = arith.select %257, %251, %249 : vector<4x1xi1>, vector<4x1xi32>
    %c128_i32 = arith.constant 128 : i32
    %259 = vector.broadcast %c128_i32 : i32 to vector<4x1xi32>
    %260 = arith.ori %258, %259 : vector<4x1xi32>
    %261 = vector.broadcast %260 : vector<4x1xi32> to vector<4x256xi32>
    %262 = arith.cmpi sge, %50, %261 : vector<4x256xi32>
    %263 = arith.extui %262 : vector<4x256xi1> to vector<4x256xi32>
    %cst_44 = arith.constant dense<0> : vector<4xi32>
    %264 = vector.multi_reduction <add>, %263, %cst_44 [1] : vector<4x256xi32> to vector<4xi32>
    %265 = vector.shape_cast %264 : vector<4xi32> to vector<4x1xi32>
    %266 = arith.cmpi sge, %265, %49 : vector<4x1xi32>
    %267 = arith.select %266, %260, %258 : vector<4x1xi1>, vector<4x1xi32>
    %c64_i32 = arith.constant 64 : i32
    %268 = vector.broadcast %c64_i32 : i32 to vector<4x1xi32>
    %269 = arith.ori %267, %268 : vector<4x1xi32>
    %270 = vector.broadcast %269 : vector<4x1xi32> to vector<4x256xi32>
    %271 = arith.cmpi sge, %50, %270 : vector<4x256xi32>
    %272 = arith.extui %271 : vector<4x256xi1> to vector<4x256xi32>
    %cst_45 = arith.constant dense<0> : vector<4xi32>
    %273 = vector.multi_reduction <add>, %272, %cst_45 [1] : vector<4x256xi32> to vector<4xi32>
    %274 = vector.shape_cast %273 : vector<4xi32> to vector<4x1xi32>
    %275 = arith.cmpi sge, %274, %49 : vector<4x1xi32>
    %276 = arith.select %275, %269, %267 : vector<4x1xi1>, vector<4x1xi32>
    %c32_i32 = arith.constant 32 : i32
    %277 = vector.broadcast %c32_i32 : i32 to vector<4x1xi32>
    %278 = arith.ori %276, %277 : vector<4x1xi32>
    %279 = vector.broadcast %278 : vector<4x1xi32> to vector<4x256xi32>
    %280 = arith.cmpi sge, %50, %279 : vector<4x256xi32>
    %281 = arith.extui %280 : vector<4x256xi1> to vector<4x256xi32>
    %cst_46 = arith.constant dense<0> : vector<4xi32>
    %282 = vector.multi_reduction <add>, %281, %cst_46 [1] : vector<4x256xi32> to vector<4xi32>
    %283 = vector.shape_cast %282 : vector<4xi32> to vector<4x1xi32>
    %284 = arith.cmpi sge, %283, %49 : vector<4x1xi32>
    %285 = arith.select %284, %278, %276 : vector<4x1xi1>, vector<4x1xi32>
    %c16_i32 = arith.constant 16 : i32
    %286 = vector.broadcast %c16_i32 : i32 to vector<4x1xi32>
    %287 = arith.ori %285, %286 : vector<4x1xi32>
    %288 = vector.broadcast %287 : vector<4x1xi32> to vector<4x256xi32>
    %289 = arith.cmpi sge, %50, %288 : vector<4x256xi32>
    %290 = arith.extui %289 : vector<4x256xi1> to vector<4x256xi32>
    %cst_47 = arith.constant dense<0> : vector<4xi32>
    %291 = vector.multi_reduction <add>, %290, %cst_47 [1] : vector<4x256xi32> to vector<4xi32>
    %292 = vector.shape_cast %291 : vector<4xi32> to vector<4x1xi32>
    %293 = arith.cmpi sge, %292, %49 : vector<4x1xi32>
    %294 = arith.select %293, %287, %285 : vector<4x1xi1>, vector<4x1xi32>
    %c8_i32 = arith.constant 8 : i32
    %295 = vector.broadcast %c8_i32 : i32 to vector<4x1xi32>
    %296 = arith.ori %294, %295 : vector<4x1xi32>
    %297 = vector.broadcast %296 : vector<4x1xi32> to vector<4x256xi32>
    %298 = arith.cmpi sge, %50, %297 : vector<4x256xi32>
    %299 = arith.extui %298 : vector<4x256xi1> to vector<4x256xi32>
    %cst_48 = arith.constant dense<0> : vector<4xi32>
    %300 = vector.multi_reduction <add>, %299, %cst_48 [1] : vector<4x256xi32> to vector<4xi32>
    %301 = vector.shape_cast %300 : vector<4xi32> to vector<4x1xi32>
    %302 = arith.cmpi sge, %301, %49 : vector<4x1xi32>
    %303 = arith.select %302, %296, %294 : vector<4x1xi1>, vector<4x1xi32>
    %c4_i32 = arith.constant 4 : i32
    %304 = vector.broadcast %c4_i32 : i32 to vector<4x1xi32>
    %305 = arith.ori %303, %304 : vector<4x1xi32>
    %306 = vector.broadcast %305 : vector<4x1xi32> to vector<4x256xi32>
    %307 = arith.cmpi sge, %50, %306 : vector<4x256xi32>
    %308 = arith.extui %307 : vector<4x256xi1> to vector<4x256xi32>
    %cst_49 = arith.constant dense<0> : vector<4xi32>
    %309 = vector.multi_reduction <add>, %308, %cst_49 [1] : vector<4x256xi32> to vector<4xi32>
    %310 = vector.shape_cast %309 : vector<4xi32> to vector<4x1xi32>
    %311 = arith.cmpi sge, %310, %49 : vector<4x1xi32>
    %312 = arith.select %311, %305, %303 : vector<4x1xi1>, vector<4x1xi32>
    %c2_i32 = arith.constant 2 : i32
    %313 = vector.broadcast %c2_i32 : i32 to vector<4x1xi32>
    %314 = arith.ori %312, %313 : vector<4x1xi32>
    %315 = vector.broadcast %314 : vector<4x1xi32> to vector<4x256xi32>
    %316 = arith.cmpi sge, %50, %315 : vector<4x256xi32>
    %317 = arith.extui %316 : vector<4x256xi1> to vector<4x256xi32>
    %cst_50 = arith.constant dense<0> : vector<4xi32>
    %318 = vector.multi_reduction <add>, %317, %cst_50 [1] : vector<4x256xi32> to vector<4xi32>
    %319 = vector.shape_cast %318 : vector<4xi32> to vector<4x1xi32>
    %320 = arith.cmpi sge, %319, %49 : vector<4x1xi32>
    %321 = arith.select %320, %314, %312 : vector<4x1xi1>, vector<4x1xi32>
    %c1_i32 = arith.constant 1 : i32
    %322 = vector.broadcast %c1_i32 : i32 to vector<4x1xi32>
    %323 = arith.ori %321, %322 : vector<4x1xi32>
    %324 = vector.broadcast %323 : vector<4x1xi32> to vector<4x256xi32>
    %325 = arith.cmpi sge, %50, %324 : vector<4x256xi32>
    %326 = arith.extui %325 : vector<4x256xi1> to vector<4x256xi32>
    %cst_51 = arith.constant dense<0> : vector<4xi32>
    %327 = vector.multi_reduction <add>, %326, %cst_51 [1] : vector<4x256xi32> to vector<4xi32>
    %328 = vector.shape_cast %327 : vector<4xi32> to vector<4x1xi32>
    %329 = arith.cmpi sge, %328, %49 : vector<4x1xi32>
    %330 = arith.select %329, %323, %321 : vector<4x1xi1>, vector<4x1xi32>
    %331 = vector.broadcast %330 : vector<4x1xi32> to vector<4x256xi32>
    %332 = arith.cmpi eq, %50, %331 : vector<4x256xi32>
    %cst_52 = arith.constant 0.000000e+00 : f32
    %333 = vector.broadcast %cst_52 : f32 to vector<4x256xf32>
    %334 = arith.select %332, %45, %333 : vector<4x256xi1>, vector<4x256xf32>
    %cst_53 = arith.constant dense<0xFF800000> : vector<4xf32>
    %335 = vector.multi_reduction <maximumf>, %334, %cst_53 [1] : vector<4x256xf32> to vector<4xf32>
    %336 = vector.shape_cast %335 : vector<4xf32> to vector<4x1xf32>
    %337 = vector.broadcast %336 : vector<4x1xf32> to vector<4x256xf32>
    %338 = arith.cmpf ogt, %45, %337 : vector<4x256xf32>
    %339 = arith.extui %338 : vector<4x256xi1> to vector<4x256xi32>
    %cst_54 = arith.constant dense<0> : vector<4xi32>
    %340 = vector.multi_reduction <add>, %339, %cst_54 [1] : vector<4x256xi32> to vector<4xi32>
    %341 = vector.shape_cast %340 : vector<4xi32> to vector<4x1xi32>
    %cst_55 = arith.constant 0.000000e+00 : f32
    %342 = vector.broadcast %cst_55 : f32 to vector<4x256xf32>
    %343 = arith.select %338, %45, %342 : vector<4x256xi1>, vector<4x256xf32>
    %cst_56 = arith.constant dense<0.000000e+00> : vector<4xf32>
    %344 = vector.multi_reduction <add>, %343, %cst_56 [1] : vector<4x256xf32> to vector<4xf32>
    %345 = vector.shape_cast %344 : vector<4xf32> to vector<4x1xf32>
    %346 = arith.subi %49, %341 : vector<4x1xi32>
    %347 = arith.sitofp %346 : vector<4x1xi32> to vector<4x1xf32>
    %348 = arith.mulf %347, %336 : vector<4x1xf32>
    %349 = arith.addf %345, %348 : vector<4x1xf32>
    %c0_i32_57 = arith.constant 0 : i32
    %350 = vector.broadcast %c0_i32_57 : i32 to vector<4x1xi32>
    %351 = arith.cmpi sgt, %49, %350 : vector<4x1xi32>
    %cst_58 = arith.constant 0.000000e+00 : f32
    %352 = vector.broadcast %cst_58 : f32 to vector<4x1xf32>
    %353 = arith.select %351, %349, %352 : vector<4x1xi1>, vector<4x1xf32>
    %cst_59 = arith.constant 0.000000e+00 : f32
    %354 = vector.broadcast %cst_59 : f32 to vector<4x256xf32>
    %355 = arith.select %7, %43, %354 : vector<4x256xi1>, vector<4x256xf32>
    %cst_60 = arith.constant dense<0.000000e+00> : vector<4xf32>
    %356 = vector.multi_reduction <add>, %355, %cst_60 [1] : vector<4x256xf32> to vector<4xf32>
    %357 = vector.shape_cast %356 : vector<4xf32> to vector<4x1xf32>
    %358 = arith.addf %357, %353 : vector<4x1xf32>
    %359 = vector.shape_cast %358 : vector<4x1xf32> to vector<1x4x1xf32>
    %cst_61 = arith.constant dense<0.000000e+00> : vector<1xf32>
    %360 = vector.multi_reduction <add>, %359, %cst_61 [1, 2] : vector<1x4x1xf32> to vector<1xf32>
    %361 = vector.shape_cast %360 : vector<1xf32> to vector<1x1x1xf32>
    %362 = vector.extract %361[0, 0, 0] : f32 from vector<1x1x1xf32>
    %363 = vector.shape_cast %12 : vector<4x1xi32> to vector<1x4x1xi32>
    %cst_62 = arith.constant dense<0> : vector<1xi32>
    %364 = vector.multi_reduction <add>, %363, %cst_62 [1, 2] : vector<1x4x1xi32> to vector<1xi32>
    %365 = vector.shape_cast %364 : vector<1xi32> to vector<1x1x1xi32>
    %366 = vector.extract %365[0, 0, 0] : i32 from vector<1x1x1xi32>
    %367 = arith.sitofp %366 : i32 to f32
    %368 = tpu.iota {dimensions = array<i32: 2>} : vector<1x1x384xi32>
    %c128_i32_63 = arith.constant 128 : i32
    %369 = vector.broadcast %c128_i32_63 : i32 to vector<1x1x384xi32>
    %370 = arith.cmpi slt, %368, %369 : vector<1x1x384xi32>
    %c256_i32_64 = arith.constant 256 : i32
    %371 = vector.broadcast %c256_i32_64 : i32 to vector<1x1x384xi32>
    %372 = arith.cmpi slt, %368, %371 : vector<1x1x384xi32>
    %373 = vector.broadcast %27 : f32 to vector<1x1x384xf32>
    %374 = vector.broadcast %367 : f32 to vector<1x1x384xf32>
    %375 = arith.select %372, %373, %374 : vector<1x1x384xi1>, vector<1x1x384xf32>
    %376 = vector.broadcast %362 : f32 to vector<1x1x384xf32>
    %377 = arith.select %370, %376, %375 : vector<1x1x384xi1>, vector<1x1x384xf32>
    %c0_65 = arith.constant 0 : index
    %c0_66 = arith.constant 0 : index
    %c0_67 = arith.constant 0 : index
    %378 = vector.load %arg4[%c0_65, %c0_66, %c0_67] : memref<1x1x384xf32, #tpu.memory_space<vmem>>, vector<1x1x384xf32>
    tpu.vector_store %arg4[%c0_65, %c0_66, %c0_67], %377 {strides = array<i32>} : memref<1x1x384xf32, #tpu.memory_space<vmem>>, vector<1x1x384xf32>,
    return
  }
  func.func @transform_0(%arg0: i32) -> (i32, i32, i32, i32) {
    %c0_i32 = arith.constant 0 : i32
    %c0_i32_0 = arith.constant 0 : i32
    %c0_i32_1 = arith.constant 0 : i32
    %c0_i32_2 = arith.constant 0 : i32
    return %arg0, %c0_i32, %c0_i32_0, %c0_i32_1 : i32, i32, i32, i32
  }
  func.func @transform_1(%arg0: i32) -> (i32, i32, i32, i32) {
    %c0_i32 = arith.constant 0 : i32
    %c0_i32_0 = arith.constant 0 : i32
    %c0_i32_1 = arith.constant 0 : i32
    %c0_i32_2 = arith.constant 0 : i32
    return %arg0, %c0_i32, %c0_i32_0, %c0_i32_1 : i32, i32, i32, i32
  }
  func.func @transform_2(%arg0: i32) -> (i32, i32, i32) {
    %c0_i32 = arith.constant 0 : i32
    %c0_i32_0 = arith.constant 0 : i32
    %c0_i32_1 = arith.constant 0 : i32
    return %arg0, %c0_i32, %c0_i32_0 : i32, i32, i32
  }
  func.func @transform_3(%arg0: i32) -> (i32, i32, i32) {
    %c0_i32 = arith.constant 0 : i32
    %c0_i32_0 = arith.constant 0 : i32
    %c0_i32_1 = arith.constant 0 : i32
    return %arg0, %c0_i32, %c0_i32_0 : i32, i32, i32
  }
}

</mosaic_0001>

<bundles_post_ra>
// kernel: tpu_custom_call.1
= control target key start
LH: loop header
LB: loop body
LE: loop exit
PB: predicated region body
PF: predicated region fallthrough
CT: control target
= control target key end

     0   :  { %s2706_s0 = inlined_call_operand.hbm [shape: f32[2,4,4,256], index: 0, kind: input, shape index: {}]   ;;  %s2707_s1 = inlined_call_operand.hbm [shape: f32[2,4,8,256], index: 1, kind: input, shape index: {}]   ;;  %s2708_s2 = inlined_call_operand.hbm [shape: s32[2,4,256], index: 2, kind: input, shape index: {}]   ;;  %s2709_s3 = inlined_call_operand.hbm [shape: f32[2,1,384], index: 3, kind: output, shape index: {}]  }
   0x1   :  { %2715 = sst [smem:[#allocation15_spill]] %s2706_s0 }
   0x2   :  { %2716 = sst [smem:[#allocation16_spill]] %s2707_s1 }
   0x3   :  { %8 = vsyncpa [#allocation3], 0 }
   0x4   :  { %10 = vsyncpa [#allocation3 + $0x1], 0 }
   0x5   :  { %11 = vsyncpa [#allocation6], 0 }
   0x6   :  { %13 = vsyncpa [#allocation6 + $0x1], 0 }
   0x7   :  { %14 = vsyncpa [#allocation4], 0 }
   0x8   :  { %16 = vsyncpa [#allocation4 + $0x1], 0  ;;  %s2014_s12 = smov 0   ;;  %s2016_s13 = smov 0  }
   0x9   :  { %s2018_s14 = smov 0   ;;  %s2020_s15 = smov 0  }
   0xa LB: > { %2717 = sst [smem:[#allocation12_spill]] %s1976_s14  ;;  %s2035_s16 = sadd.s32 4294967295, %s1980_s15   ;;  %s1980_s15 = sphi %s2020_s15, %s2742_s15   ;;  %s1976_s14 = sphi %s2018_s14, %s2744_s14   ;;  %s1972_s13 = sphi %s2016_s13, %s2746_s13   ;;  %s1968_s12 = sphi %s2014_s12, %s2745_s12  }
   0xb   : > { %s1697_s17 = sadd.s32 4294967294, %s1980_s15   ;;  %s2039_s18 = sadd.s32 1, %s1980_s15  }
   0xc   : > { %2718 = sst [smem:[#allocation13_spill]] %s2039_s18  ;;  %s29_s19 = sadd.s32 1, %s1976_s14 }
   0xd   : > { %s26_s20 = ssub.s32 %s1980_s15, %s2039_s18  ;;  %p36_p0 = scmp.ne.s32.totalorder %s1976_s14, %s1972_s13 }
   0xe   : > { %p27_p1 = scmp.eq.s32.totalorder %s26_s20, 0  ;;  %p37_p2 = scmp.eq.s32.totalorder %s1980_s15, 0 }
   0xf   : > { %p42_p3 = scmp.ne.s32.totalorder %s1972_s13, %s1968_s12  ;;  %p43_p4 = scmp.eq.s32.totalorder %s2035_s16, 0 }
  0x10   : > { %s2051_s21 = scalar_select %p27_p1, %s1976_s14, %s29_s19  }
  0x11   : > { %p38_p5 = por %p37_p2, %p36_p0  ;;  %p2053_p6 = por %p43_p4, %p42_p3 }
  0x12   : > { %2719 = sst [smem:[#allocation14_spill]] %s2051_s21  ;;  %p118_p7 = scmp.eq.s32.totalorder %s2035_s16, 1 }
  0x13   : > { %s2720_s22 = scalar_select %p2053_p6, 1, 0 }
  0x14   : > { %p124_p8 = scmp.eq.s32.totalorder %s1697_s17, 1  ;;  %p1754_p10 = scmp.lt.s32.totalorder %s1980_s15, 2 }
  0x15   : > { %p2060_p11 = por %p118_p7, %p36_p0  ;;  %s2069_s25 = sand.u32 1, %s1976_s14  }
  0x16   : > { %p2064_p12 = por %p124_p8, %p42_p3  ;;  %p2071_p13 = pnand %p1754_p10, %p38_p5 }
  0x17   : > { %s2721_s23 = scalar_select %p2060_p11, 1, 0 }
  0x18   : > { %s2722_s24 = scalar_select %p2064_p12, 1, 0 }
  0x19   : > { %s165_s27 = sand.u32 1, %s1980_s15   ;;  %s1703_s28 = sshll.u32 %s2069_s25, 6 }
  0x1a   : > { %s1722_s29 = sshll.u32 %s1980_s15, 10  ;;  %s2724_s1 = sld [smem:[#allocation16_spill]] }
  0x1b   : > { %s169_s6 = scalar_lea.vmem [#allocation5], %s1703_s28  ;;  %s2086_s8 = scalar_lea.sflag [#allocation6], %s165_s27 }
  0x1c   : > { %s176_s7 = sshll.u32 %s169_s6, 4  ;;  %p2092_p2 = pneg %p2071_p13  ;;  %s2083_s7 = int_to_ptr.vmem [resolvable:$true] %s176_s7 }
  0x20   : > { %s2081_s5 = scalar_lea.hbm %s2724_s1, %s1722_s29  ;;  %s1833_s19 = scalar_lea.hbm %s2724_s1, 2048 }
  0x21   : > { %s1828_s9 = scalar_lea.hbm %s2081_s5, 1024  ;;  %p1834_p5 = scmp.lt.s32.totalorder %s2081_s5, %s2724_s1 }
  0x22   : > { %p1829_p1 = scmp.ne.s32.totalorder %s2081_s5, %s1828_s9  ;;  %p1835_p7 = scmp.lt.s32.totalorder %s1833_s19, %s1828_s9 }
  0x24   : > { %p1831_p3 = pnand %p2092_p2, %p1829_p1  ;;  %p1836_p8 = por %p1835_p7, %p1834_p5 }
  0x26   : > { %p1832_p4 = pneg %p1831_p3 }
  0x28   : > { %p1837_p10 = pnand %p1836_p8, %p1832_p4 }
  0x2a   : > { %1840 = shalt.err (!%p1837_p10)
}
  0x2b   : > { %s1841_s27 = scalar_lea.vmem %s2083_s7, 1024  ;;  %s1982_s29 = smov [#allocation5]  }
  0x2c   : > { %p1842_p9 = scmp.ne.s32.totalorder %s2083_s7, %s1841_s27  ;;  %s1846_s30 = sshll.u32 %s1982_s29, 4  ;;  %s1847_s30 = int_to_ptr.vmem [resolvable:$false] %s1846_s30 }
  0x2d   : > { %s1848_s4 = scalar_lea.vmem %s1847_s30, 2048  ;;  %p1849_p0 = scmp.lt.s32.totalorder %s2083_s7, %s1847_s30 }
  0x2e   : > { %p1844_p1 = pnand %p1842_p9, %p2092_p2  ;;  %p1850_p12 = scmp.lt.s32.totalorder %s1848_s4, %s1841_s27 }
  0x30   : > { %p1845_p3 = pneg %p1844_p1  ;;  %p1851_p11 = por %p1850_p12, %p1849_p0 }
  0x32   : > { %p1852_p6 = pnand %p1851_p11, %p1845_p3 }
  0x34   : > { %1855 = shalt.err (!%p1852_p6)
}
  0x35   : > { %s1983_s6 = smov 256   ;;  %s1984_s9 = smov 16  }
  0x36   : > { %1746 = dma.hbm_to_vmem [thread:$0]  (!%p2071_p13), %s2081_s5, 1024, %s2083_s7, %s2086_s8, %s1983_s6, %s1983_s6, %s1984_s9  }
  0x37   : > { %p203_p9 = scmp.lt.s32.totalorder %s1980_s15, 3  ;;  %s1700_s11 = sshll.u32 %s2069_s25, 5 }
  0x38   : > { %s1721_s17 = sshll.u32 %s1980_s15, 9  ;;  %p2726_p11 = scmp.ge.s32.totalorder %s1980_s15, 1 }
  0x39   : > { %s2728_s0 = sld [smem:[#allocation15_spill]]  ;;  %s148_s29 = scalar_lea.vmem [#allocation2], %s1700_s11 }
  0x3a   : > { %p2120_p6 = pnand %p2726_p11, %p203_p9  ;;  %s155_s30 = sshll.u32 %s148_s29, 4  ;;  %s2129_s30 = int_to_ptr.vmem [resolvable:$true] %s155_s30 }
  0x3b   : > { %s1706_s5 = sshll.u32 %s2069_s25, 3  ;;  %s145_s7 = scalar_lea.sflag [#allocation3], %s2069_s25 }
  0x3c   : > { %s2727_s19 = scalar_select %p2120_p6, 1, 0 }
  0x3f   : > { %s2127_s27 = scalar_lea.hbm %s2728_s0, %s1721_s17  ;;  %s1861_s20 = scalar_lea.hbm %s2728_s0, 1024 }
  0x40   : > { %s1856_s4 = scalar_lea.hbm %s2127_s27, 512  ;;  %p1862_p5 = scmp.lt.s32.totalorder %s2127_s27, %s2728_s0 }
  0x41   : > { %p1857_p12 = scmp.ne.s32.totalorder %s2127_s27, %s1856_s4  ;;  %p1863_p7 = scmp.lt.s32.totalorder %s1861_s20, %s1856_s4 }
  0x43   : > { %p1859_p0 = pnand %p1857_p12, %p2092_p2  ;;  %p1864_p8 = por %p1863_p7, %p1862_p5 }
  0x45   : > { %p1860_p4 = pneg %p1859_p0 }
  0x47   : > { %p1865_p10 = pnand %p1864_p8, %p1860_p4 }
  0x49   : > { %1868 = shalt.err (!%p1865_p10)
}
  0x4a   : > { %s1869_s11 = scalar_lea.vmem %s2129_s30, 512  ;;  %s1985_s29 = smov [#allocation2]  }
  0x4b   : > { %p1870_p1 = scmp.ne.s32.totalorder %s2129_s30, %s1869_s11  ;;  %s1874_s6 = sshll.u32 %s1985_s29, 4  ;;  %s1875_s6 = int_to_ptr.vmem [resolvable:$false] %s1874_s6 }
  0x4c   : > { %s1876_s9 = scalar_lea.vmem %s1875_s6, 1024  ;;  %p1877_p11 = scmp.lt.s32.totalorder %s2129_s30, %s1875_s6 }
  0x4d   : > { %p1872_p3 = pnand %p1870_p1, %p2092_p2  ;;  %p1878_p12 = scmp.lt.s32.totalorder %s1876_s9, %s1869_s11 }
  0x4f   : > { %p1873_p9 = pneg %p1872_p3  ;;  %p1879_p0 = por %p1878_p12, %p1877_p11 }
  0x51   : > { %p1880_p6 = pnand %p1879_p0, %p1873_p9 }
  0x53   : > { %1883 = shalt.err (!%p1880_p6)
}
  0x54   : > { %s1986_s4 = smov 128   ;;  %s1987_s20 = smov 8  }
  0x55   : > { %1743 = dma.hbm_to_vmem [thread:$0]  (!%p2071_p13), %s2127_s27, 512, %s2129_s30, %s145_s7, %s1986_s4, %s1986_s4, %s1987_s20  }
  0x56   : > { %s1723_s17 = sshll.u32 %s1980_s15, 7  ;;  %s190_s6 = scalar_lea.vmem [#allocation7], %s1706_s5 }
  0x57   : > { %s196_s11 = scalar_lea.hbm %s2708_s2, %s1723_s17  ;;  %s198_s9 = sshll.u32 %s190_s6, 4  ;;  %s199_s9 = int_to_ptr.vmem [resolvable:$true] %s198_s9 }
  0x58   : > { %s1884_s0 = scalar_lea.hbm %s196_s11, 128  ;;  %s1889_s14 = scalar_lea.hbm %s2708_s2, 256 }
  0x59   : > { %p1885_p6 = scmp.ne.s32.totalorder %s196_s11, %s1884_s0  ;;  %p1890_p7 = scmp.lt.s32.totalorder %s196_s11, %s2708_s2 }
  0x5a   : > { %p1891_p8 = scmp.lt.s32.totalorder %s1889_s14, %s1884_s0 }
  0x5b   : > { %p1887_p4 = pnand %p1885_p6, %p2092_p2 }
  0x5c   : > { %p1892_p10 = por %p1891_p8, %p1890_p7 }
  0x5d   : > { %p1888_p5 = pneg %p1887_p4 }
  0x5f   : > { %p1893_p1 = pnand %p1892_p10, %p1888_p5 }
  0x61   : > { %1896 = shalt.err (!%p1893_p1)
}
  0x62   : > { %s1897_s25 = scalar_lea.vmem %s199_s9, 128  ;;  %s1988_s30 = smov [#allocation7]  }
  0x63   : > { %p1898_p3 = scmp.ne.s32.totalorder %s199_s9, %s1897_s25  ;;  %s1902_s5 = sshll.u32 %s1988_s30, 4  ;;  %s1903_s5 = int_to_ptr.vmem [resolvable:$false] %s1902_s5 }
  0x64   : > { %s1904_s7 = scalar_lea.vmem %s1903_s5, 256  ;;  %p1905_p12 = scmp.lt.s32.totalorder %s199_s9, %s1903_s5 }
  0x65   : > { %p1900_p9 = pnand %p1898_p3, %p2092_p2  ;;  %p1906_p0 = scmp.lt.s32.totalorder %s1904_s7, %s1897_s25 }
  0x67   : > { %p1901_p11 = pneg %p1900_p9  ;;  %p1907_p6 = por %p1906_p0, %p1905_p12 }
  0x69   : > { %p1908_p4 = pnand %p1907_p6, %p1901_p11 }
  0x6b   : > { %1911 = shalt.err (!%p1908_p4)
}
  0x6c   : > { %1749 = dma.hbm_to_vmem [thread:$0]  (!%p2071_p13), %s196_s11, 128, %s199_s9, %s2086_s8  }
  0x6d   : > { %p2729_p5 = scmp.ne.s32.totalorder %s2727_s19, 0 }
  0x6e   : > { %s2177_s0 = sand.u32 (!%p2729_p5), 1, %s1972_s13   ;;  %p2730_p2 = scmp.ne.s32.totalorder (!%p2729_p5), %s2720_s22, 0 }
  0x6f   : > { %207 = sbr.rel (%p2729_p5) target bundleno = 5606 (0x15e6), region = 32  ;;  %s1710_s1 = sshll.u32 (!%p2729_p5), %s2177_s0, 5 }
  0x70   : > { %s210_s14 = scalar_lea.sflag (!%p2729_p5), [#allocation3], %s2177_s0  ;;  %s2181_s18 = scalar_lea.vmem (!%p2729_p5), [#allocation2], %s1710_s1 }
  0x74   : > { %1955 = dma.done.wait (%p2730_p2), %s210_s14, 512  }
  0x75   : > { %1957 = vsyncadd (%p2730_p2), %s210_s14, 4294966784  ;;  %s218_s21 = sand.u32 1, %s2035_s16   ;;  %s1711_s26 = sshll.u32 %s2177_s0, 6 }
  0x76   : > { %s219_s8 = scalar_lea.sflag [#allocation6], %s218_s21  ;;  %s2189_s10 = scalar_lea.vmem [#allocation5], %s1711_s26 }
  0x77   : > { %1959 = dma.done.wait (%p2730_p2), %s219_s8, 1152  }
  0x78   : > { %1961 = vsyncadd (%p2730_p2), %s219_s8, 4294966144  ;;  %s1712_s19 = sshll.u32 %s2177_s0, 3  ;;  %vm281_vm0 = vcmask 1043456   ;;  %v1989_v1 = vmov 0   ;;  %v450_v8 = vlaneseq  ;;  %v1990_v9 = vmov 1966171168  }
  0x79   : > { %s231_s4 = scalar_lea.vmem [#allocation7], %s1712_s19  ;;  %v453_v10 = vunpack.c.l.s4 %v1990_v9  ;;  %v2208_v12 = vld [vmem:[%s2189_s10] sm:$0xff]  ;;  %v2211_v13 = vld [vmem:[%s2189_s10 + $0x8] sm:$0xff]  ;;  %v2219_v18 = vld [vmem:[%s2189_s10 + $0x10] sm:$0xff]  ;;  %vm422_vm10 = vcmask 1041409   ;;  %vm738_vm11 = vcmask 1045509  }
  0x7a   : > { %v2196_v0 = vld [vmem:[%s231_s4] sm:$0xff]  ;;  %v2214_v14 = vshrl.u32 %v450_v8, 7  ;;  %v572_v16 = vrot.slane %v2208_v12, 4  ;;  %v578_v17 = vrot.slane %v2211_v13, 4  ;;  %v584_v22 = vrot.slane %v2219_v18, 4  ;;  %v2228_v23 = vld [vmem:[%s2189_s10 + $0x18] sm:$0xff] }
  0x7b   : > { %vm277_vm1 = vcmp.gt.s32.totalorder %v2196_v0, 0  ;;  %v454_v15 = vunpack.c.0.s8 %v453_v10  ;;  %v590_v28 = vrot.slane %v2228_v23, 4  ;;  %v2235_v29 = vld [vmem:[%s2189_s10 + $0x20] sm:$0xff]  ;;  %v2238_v30 = vld [vmem:[%s2189_s10 + $0x28] sm:$0xff]  ;;  %v2241_v31 = vld [vmem:[%s2189_s10 + $0x30] sm:$0xff]  ;;  %vm425_vm12 = vcmask 1042434  }
  0x7c   : > { %v278_v2 = vsel %vm277_vm1, 1, %v1989_v1  ;;  %v573_v20 = vmax.f32 %v2208_v12, %v572_v16  ;;  %v579_v21 = vmax.f32 %v2211_v13, %v578_v17  ;;  %v585_v27 = vmax.f32 %v2219_v18, %v584_v22  ;;  %v2247_v34 = vld [vmem:[%s2189_s10 + $0x38] sm:$0xff]  ;;  %s1724_s20 = smul.u32 3, %s2177_s0  ;;  %s1570_s5 = scalar_lea.sflag [#allocation4], %s2177_s0 }
  0x7d   : > { %v280_v3 = vcombine.high %v278_v2, %v278_v2  ;;  %v282_v4 = vsel %vm281_vm0, %v278_v2, 0  ;;  %v2222_v19 = vsub.s32 %v454_v15, %v2214_v14  ;;  %v2244_v33 = vsub.s32 0, %v2214_v14  ;;  %s1731_s11 = smul.u32 48, %s2035_s16  ;;  %p2739_p7 = scmp.ne.s32.totalorder %s2721_s23, 0 }
  0x7e   : > { %v574_v25 = vrot.slane %v573_v20, 2  ;;  %v580_v26 = vrot.slane %v579_v21, 2  ;;  %v586_v38 = vrot.slane %v585_v27, 2  ;;  %v591_v39 = vmax.f32 %v2228_v23, %v590_v28  ;;  %s263_s6 = scalar_lea.vmem [#allocation8], %s1724_s20  ;;  %s1993_s16 = smov [#allocation8]  }
  0x7f   : > { %v283_v5 = vsel %vm281_vm0, %v280_v3, 0  ;;  %v458_v24 = vrot.slane %v2196_v0, %v2222_v19  ;;  %v596_v40 = vrot.slane %v2235_v29, 4  ;;  %v602_v41 = vrot.slane %v2238_v30, 4  ;;  %s1584_s9 = sshll.u32 %s263_s6, 4  ;;  %s1582_s30 = scalar_lea.hbm %s2709_s3, %s1731_s11  ;;  %s1585_s9 = int_to_ptr.vmem [resolvable:$true] %s1584_s9 }
  0x80   : > { %v2204_v6 = vadd.s32 %v283_v5, %v282_v4  ;;  %v575_v36 = vmax.f32 %v573_v20, %v574_v25  ;;  %v581_v37 = vmax.f32 %v579_v21, %v580_v26  ;;  %v608_v42 = vrot.slane %v2241_v31, 4  ;;  %s1912_s7 = scalar_lea.vmem %s1585_s9, 48  ;;  %s1916_s1 = sshll.u32 %s1993_s16, 4  ;;  %s1917_s1 = int_to_ptr.vmem [resolvable:$false] %s1916_s1 }
  0x81   : > { %v459_v32 = vcombine.high %v458_v24, %v458_v24  ;;  %v2250_v35 = vrot.slane %v458_v24, %v2222_v19  ;;  %v587_v45 = vmax.f32 %v585_v27, %v586_v38  ;;  %v614_v46 = vrot.slane %v2247_v34, 4  ;;  %p1913_p13 = scmp.ne.s32.totalorder %s1585_s9, %s1912_s7  ;;  %s1918_s14 = scalar_lea.vmem %s1917_s1, 96 }
  0x82   : > { %v286_v7 = vshrl.u32 %v2204_v6, 16  ;;  %v576_v43 = vrot.slane %v575_v36, 1  ;;  %v582_v44 = vrot.slane %v581_v37, 1  ;;  %v592_v47 = vrot.slane %v591_v39, 2  ;;  %p1919_p1 = scmp.lt.s32.totalorder %s1585_s9, %s1917_s1  ;;  %p1920_p3 = scmp.lt.s32.totalorder %s1918_s14, %s1912_s7 }
  0x83   : > { %v597_v48 = vmax.f32 %v2235_v29, %v596_v40  ;;  %v603_v49 = vmax.f32 %v2238_v30, %v602_v41  ;;  %v609_v50 = vmax.f32 %v2241_v31, %v608_v42  ;;  %v588_v53 = vrot.slane %v587_v45, 1  ;;  %p1914_p8 = pnand %p1913_p13, %p2739_p7 }
  0x84   : > { %v288_v11 = vcvt.s32.f32 %v286_v7  ;;  %v2260_v51 = vmax.f32 %v575_v36, %v576_v43  ;;  %v2262_v52 = vmax.f32 %v581_v37, %v582_v44  ;;  %v615_v54 = vmax.f32 %v2247_v34, %v614_v46  ;;  %p1921_p9 = por %p1920_p3, %p1919_p1 }
  0x85   : > { %v593_v55 = vmax.f32 %v591_v39, %v592_v47  ;;  %v598_v56 = vrot.slane %v597_v48, 2  ;;  %v604_v57 = vrot.slane %v603_v49, 2  ;;  %v610_v58 = vrot.slane %v609_v50, 2  ;;  %p1915_p10 = pneg %p1914_p8 }
  0x86   : > { %291 = vadd.xlane.f32.xlu0 %v288_v11  ;;  %v2265_v59 = vmax.f32 %v587_v45, %v588_v53  ;;  %v616_v60 = vrot.slane %v615_v54, 2  ;;  %v620_v61 = vsub.f32 %v2208_v12, %v2260_v51  ;;  %v621_v62 = vsub.f32 %v2211_v13, %v2262_v52 }
  0x87   : > { %v594_v63 = vrot.slane %v593_v55, 1  ;;  %v599_v2 = vmax.f32 %v597_v48, %v598_v56  ;;  %v605_v3 = vmax.f32 %v603_v49, %v604_v57  ;;  %v611_v4 = vmax.f32 %v609_v50, %v610_v58  ;;  %p1922_p11 = pnand %p1921_p9, %p1915_p10 }
  0x88   : > { %v617_v5 = vmax.f32 %v615_v54, %v616_v60  ;;  %v622_v7 = vsub.f32 %v2219_v18, %v2265_v59  ;;  %v628_v9 = vmul.f32 1.442695, %v620_v61  ;;  %v630_v10 = vmul.f32 1.442695, %v621_v62 }
  0x89   : > { %v2273_v11 = vmax.f32 %v593_v55, %v594_v63  ;;  %v600_v15 = vrot.slane %v599_v2, 1  ;;  %v606_v16 = vrot.slane %v605_v3, 1  ;;  %v612_v17 = vrot.slane %v611_v4, 1 }
  0x8a   : > { %v618_v20 = vrot.slane %v617_v5, 1  ;;  %1796 = vpow2.f32 %v628_v9  ;;  %v632_v21 = vmul.f32 1.442695, %v622_v7  ;;  %v285_v22 = vand.u32 65535, %v2204_v6 }
  0x8b   : > { %v2276_v24 = vmax.f32 %v599_v2, %v600_v15  ;;  %v2278_v25 = vmax.f32 %v605_v3, %v606_v16  ;;  %v2280_v26 = vmax.f32 %v611_v4, %v612_v17  ;;  %v623_v27 = vsub.f32 %v2228_v23, %v2273_v11 }
  0x8c   : > { %v473_v28 = vrot.slane %v459_v32, %v2222_v19  ;;  %v2285_v36 = vmax.f32 %v617_v5, %v618_v20  ;;  %1798 = vpow2.f32 %v630_v10  ;;  %v287_v37 = vcvt.s32.f32 %v285_v22 }
  0x8d   : > { %v624_v38 = vsub.f32 %v2235_v29, %v2276_v24  ;;  %v625_v6 = vsub.f32 %v2238_v30, %v2278_v25  ;;  %v626_v39 = vsub.f32 %v2241_v31, %v2280_v26  ;;  %1800 = vpow2.f32 %v632_v21 }
  0x8e   : > { %v474_v40 = vcombine.high %v2250_v35, %v2250_v35  ;;  %v482_v41 = vsub.s32 1, %v2214_v14  ;;  %v627_v32 = vsub.f32 %v2247_v34, %v2285_v36  ;;  %v634_v42 = vmul.f32 1.442695, %v623_v27  ;;  %289 = vadd.xlane.f32.xlu0 %v287_v37 }
  0x8f   : > { %v475_v43 = vcombine.high %v473_v28, %v473_v28  ;;  %v636_v44 = vmul.f32 1.442695, %v624_v38  ;;  %v638_v45 = vmul.f32 1.442695, %v625_v6  ;;  %v640_v46 = vmul.f32 1.442695, %v626_v39 }
  0x90   : > { %v479_v47 = vrot.slane %v2250_v35, %v2244_v33  ;;  %1802 = vpow2.f32 %v634_v42  ;;  %v642_v48 = vmul.f32 1.442695, %v627_v32  ;;  %v483_v49 = vrot.slane %v2250_v35, %v482_v41 }
  0x91   : > { %v487_v50 = vrot.slane %v473_v28, %v2244_v33  ;;  %1804 = vpow2.f32 %v636_v44  ;;  %v491_v53 = vrot.slane %v473_v28, %v482_v41  ;;  %v495_v54 = vrot.slane %v474_v40, %v2244_v33 }
  0x92   : > { %v499_v55 = vrot.slane %v474_v40, %v482_v41  ;;  %1806 = vpow2.f32 %v638_v45  ;;  %v503_v56 = vrot.slane %v475_v43, %v2244_v33  ;;  %vm508_vm2 = vcmp.eq.s32.totalorder %v2214_v14, %v479_v47 }
  0x93   : > { %1808 = vpow2.f32 %v640_v46  ;;  %v507_v57 = vrot.slane %v475_v43, %v482_v41  ;;  %vm509_vm3 = vcmp.eq.s32.totalorder %v2214_v14, %v483_v49  ;;  %vm510_vm4 = vcmp.eq.s32.totalorder %v2214_v14, %v487_v50 }
  0x94   : > { %1810 = vpow2.f32 %v642_v48  ;;  %vm511_vm5 = vcmp.eq.s32.totalorder %v2214_v14, %v491_v53  ;;  %vm512_vm6 = vcmp.eq.s32.totalorder %v2214_v14, %v495_v54  ;;  %vm513_vm7 = vcmp.eq.s32.totalorder %v2214_v14, %v499_v55 }
  0x95   : > { %vm514_vm8 = vcmp.eq.s32.totalorder %v2214_v14, %v503_v56  ;;  %v516_v33 = vsel %vm508_vm2, %v2208_v12, 0.0  ;;  %v517_v58 = vsel %vm509_vm3, %v2211_v13, 0.0  ;;  %v518_v60 = vsel %vm510_vm4, %v2219_v18, 0.0 }
  0x96   : > { %vm515_vm9 = vcmp.eq.s32.totalorder %v2214_v14, %v507_v57  ;;  %v519_v63 = vsel %vm511_vm5, %v2228_v23, 0.0  ;;  %v2317_v2 = vsel %vm512_vm6, %v2235_v29, 0.0  ;;  %v2320_v3 = vsel %vm513_vm7, %v2238_v30, 0.0 }
  0x97   : > { %v1797_v35 = vpop.eup %1796  ;;  %v2323_v5 = vsel %vm514_vm8, %v2241_v31, 0.0  ;;  %v524_v12 = vrot.slane %v516_v33, 4  ;;  %v530_v18 = vrot.slane %v517_v58, 4  ;;  %v536_v9 = vrot.slane %v518_v60, 4 }
  0x98   : > { %v644_v61 = vrot.slane %v1797_v35, 4  ;;  %v2326_v15 = vsel %vm515_vm9, %v2247_v34, 0.0  ;;  %v542_v23 = vrot.slane %v519_v63, 4  ;;  %v548_v30 = vrot.slane %v2317_v2, 4 }
  0x99   : > { %v1799_v62 = vpop.eup %1798  ;;  %v554_v20 = vrot.slane %v2320_v3, 4  ;;  %v560_v31 = vrot.slane %v2323_v5, 4  ;;  %v2331_v27 = vadd.f32 %v524_v12, %v516_v33  ;;  %v531_v34 = vadd.f32 %v530_v18, %v517_v58 }
  0x9a   : > { %v1801_v4 = vpop.eup %1800  ;;  %v645_v13 = vadd.f32 %v1797_v35, %v644_v61  ;;  %v650_v7 = vrot.slane %v1799_v62, 4  ;;  %v537_v39 = vadd.f32 %v536_v9, %v518_v60  ;;  %v566_v47 = vrot.slane %v2326_v15, 4 }
  0x9b   : > { %v656_v10 = vrot.slane %v1801_v4, 4  ;;  %v543_v18 = vadd.f32 %v542_v23, %v519_v63  ;;  %vm742_vm13 = vcmask 1046534   ;;  %vm428_vm14 = vcmask 1043459  }
  0x9c   : > { %v646_v16 = vrot.slane %v645_v13, 2  ;;  %v651_v29 = vadd.f32 %v1799_v62, %v650_v7  ;;  %v538_v63 = vrot.slane %v537_v39, 2  ;;  %vm746_vm15 = vcmask 1047559  }
  0x9d   : > { %v1803_v17 = vpop.eup %1802  ;;  %v657_v21 = vadd.f32 %v1801_v4, %v656_v10 }
  0x9e   : > { %v1805_v22 = vpop.eup %1804  ;;  %v647_v28 = vadd.f32 %v646_v16, %v645_v13  ;;  %v652_v37 = vrot.slane %v651_v29, 2  ;;  %v662_v38 = vrot.slane %v1803_v17, 4 }
  0x9f   : > { %v1807_v6 = vpop.eup %1806  ;;  %v658_v40 = vrot.slane %v657_v21, 2  ;;  %v668_v41 = vrot.slane %v1805_v22, 4 }
  0xa0   : > { %v1809_v32 = vpop.eup %1808  ;;  %v648_v42 = vrot.slane %v647_v28, 1  ;;  %v653_v43 = vadd.f32 %v652_v37, %v651_v29  ;;  %v663_v44 = vadd.f32 %v1803_v17, %v662_v38  ;;  %v674_v45 = vrot.slane %v1807_v6, 4 }
  0xa1   : > { %v1811_v46 = vpop.eup %1810  ;;  %v659_v48 = vadd.f32 %v658_v40, %v657_v21  ;;  %v669_v49 = vadd.f32 %v1805_v22, %v668_v41  ;;  %v680_v50 = vrot.slane %v1809_v32, 4  ;;  %v549_v21 = vadd.f32 %v548_v30, %v2317_v2 }
  0xa2   : > { %v649_v53 = vadd.f32 %v648_v42, %v647_v28  ;;  %v654_v54 = vrot.slane %v653_v43, 1  ;;  %v664_v55 = vrot.slane %v663_v44, 2  ;;  %v675_v56 = vadd.f32 %v1807_v6, %v674_v45 }
  0xa3   : > { %v660_v57 = vrot.slane %v659_v48, 1  ;;  %v670_v35 = vrot.slane %v669_v49, 2  ;;  %v681_v33 = vadd.f32 %v1809_v32, %v680_v50  ;;  %v686_v58 = vrot.slane %v1811_v46, 4 }
  0xa4   : > { %v655_v60 = vadd.f32 %v654_v54, %v653_v43  ;;  %v665_v61 = vadd.f32 %v664_v55, %v663_v44  ;;  %v676_v62 = vrot.slane %v675_v56, 2  ;;  %1812 = vlog2.f32 %v649_v53 }
  0xa5   : > { %v661_v4 = vadd.f32 %v660_v57, %v659_v48  ;;  %v671_v12 = vadd.f32 %v670_v35, %v669_v49  ;;  %v682_v13 = vrot.slane %v681_v33, 2  ;;  %v687_v7 = vadd.f32 %v1811_v46, %v686_v58 }
  0xa6   : > { %v666_v9 = vrot.slane %v665_v61, 1  ;;  %v677_v10 = vadd.f32 %v676_v62, %v675_v56  ;;  %1814 = vlog2.f32 %v655_v60  ;;  %v555_v22 = vadd.f32 %v554_v20, %v2320_v3 }
  0xa7   : > { %v672_v16 = vrot.slane %v671_v12, 1  ;;  %v683_v29 = vadd.f32 %v682_v13, %v681_v33  ;;  %v688_v17 = vrot.slane %v687_v7, 2  ;;  %1816 = vlog2.f32 %v661_v4 }
  0xa8   : > { %v667_v28 = vadd.f32 %v666_v9, %v665_v61  ;;  %v678_v37 = vrot.slane %v677_v10, 1  ;;  %v526_v38 = vrot.slane %v2331_v27, 2  ;;  %v532_v32 = vrot.slane %v531_v34, 2 }
  0xa9   : > { %v673_v6 = vadd.f32 %v672_v16, %v671_v12  ;;  %v684_v40 = vrot.slane %v683_v29, 1  ;;  %v689_v41 = vadd.f32 %v688_v17, %v687_v7  ;;  %v561_v42 = vadd.f32 %v560_v31, %v2323_v5 }
  0xaa   : > { %v679_v23 = vadd.f32 %v678_v37, %v677_v10  ;;  %1818 = vlog2.f32 %v667_v28  ;;  %v544_v45 = vrot.slane %v543_v18, 2  ;;  %v550_v2 = vrot.slane %v549_v21, 2 }
  0xab   : > { %v685_v43 = vadd.f32 %v684_v40, %v683_v29  ;;  %v690_v44 = vrot.slane %v689_v41, 1  ;;  %1820 = vlog2.f32 %v673_v6  ;;  %v567_v3 = vadd.f32 %v566_v47, %v2326_v15 }
  0xac   : > { %1822 = vlog2.f32 %v679_v23  ;;  %v527_v30 = vadd.f32 %v526_v38, %v2331_v27  ;;  %v556_v20 = vrot.slane %v555_v22, 2  ;;  %v533_v48 = vadd.f32 %v532_v32, %v531_v34 }
  0xad   : > { %v691_v46 = vadd.f32 %v690_v44, %v689_v41  ;;  %1824 = vlog2.f32 %v685_v43  ;;  %v539_v49 = vadd.f32 %v538_v63, %v537_v39  ;;  %v562_v50 = vrot.slane %v561_v42, 2 }
  0xae   : > { %v545_v53 = vadd.f32 %v544_v45, %v543_v18  ;;  %v551_v54 = vadd.f32 %v550_v2, %v549_v21  ;;  %v568_v5 = vrot.slane %v567_v3, 2  ;;  %v528_v55 = vrot.slane %v527_v30, 1 }
  0xaf   : > { %1826 = vlog2.f32 %v691_v46  ;;  %v557_v56 = vadd.f32 %v556_v20, %v555_v22  ;;  %v534_v57 = vrot.slane %v533_v48, 1  ;;  %v540_v35 = vrot.slane %v539_v49, 1 }
  0xb0   : > { %v563_v47 = vadd.f32 %v562_v50, %v561_v42  ;;  %v546_v27 = vrot.slane %v545_v53, 1  ;;  %v552_v60 = vrot.slane %v551_v54, 1  ;;  %v569_v61 = vadd.f32 %v568_v5, %v567_v3 }
  0xb1   : > { %v1813_v31 = vpop.eup %1812  ;;  %v529_v34 = vadd.f32 %v528_v55, %v527_v30  ;;  %v558_v39 = vrot.slane %v557_v56, 1  ;;  %v535_v13 = vadd.f32 %v534_v57, %v533_v48  ;;  %v541_v7 = vadd.f32 %v540_v35, %v539_v49 }
  0xb2   : > { %v693_v33 = vmul.f32 0.6931472, %v1813_v31  ;;  %v564_v10 = vrot.slane %v563_v47, 1  ;;  %v547_v17 = vadd.f32 %v546_v27, %v545_v53  ;;  %v570_v21 = vrot.slane %v569_v61, 1 }
  0xb3   : > { %v1815_v15 = vpop.eup %1814  ;;  %v553_v37 = vadd.f32 %v552_v60, %v551_v54  ;;  %v559_v38 = vadd.f32 %v558_v39, %v557_v56 }
  0xb4   : > { %v1817_v58 = vpop.eup %1816  ;;  %v695_v62 = vmul.f32 0.6931472, %v1815_v15  ;;  %v708_v12 = vadd.f32 %v693_v33, %v2260_v51  ;;  %v571_v2 = vadd.f32 %v570_v21, %v569_v61 }
  0xb5   : > { %v697_v4 = vmul.f32 0.6931472, %v1817_v58 }
  0xb6   : > { %v709_v18 = vadd.f32 %v695_v62, %v2262_v52  ;;  %v716_v40 = vsub.f32 %v708_v12, %v529_v34  ;;  %v565_v52 = vadd.f32 %v564_v10, %v563_v47 }
  0xb7   : > { %v1819_v9 = vpop.eup %1818  ;;  %v710_v16 = vadd.f32 %v697_v4, %v2265_v59 }
  0xb8   : > { %v1821_v29 = vpop.eup %1820  ;;  %v699_v22 = vmul.f32 0.6931472, %v1819_v9  ;;  %v717_v63 = vsub.f32 %v709_v18, %v535_v13 }
  0xb9   : > { %v1823_v28 = vpop.eup %1822  ;;  %v701_v6 = vmul.f32 0.6931472, %v1821_v29  ;;  %v718_v23 = vsub.f32 %v710_v16, %v541_v7 }
  0xba   : > { %v1825_v41 = vpop.eup %1824  ;;  %v703_v32 = vmul.f32 0.6931472, %v1823_v28  ;;  %v711_v51 = vadd.f32 %v699_v22, %v2273_v11  ;;  %v732_v48 = vcombine.low %v716_v40, %v717_v63 }
  0xbb   : > { %v705_v42 = vmul.f32 0.6931472, %v1825_v41  ;;  %v712_v43 = vadd.f32 %v701_v6, %v2276_v24 }
  0xbc   : > { %v1827_v59 = vpop.eup %1826  ;;  %v713_v44 = vadd.f32 %v703_v32, %v2278_v25  ;;  %v719_v45 = vsub.f32 %v711_v51, %v547_v17 }
  0xbd   : > { %v707_v3 = vmul.f32 0.6931472, %v1827_v59  ;;  %v714_v30 = vadd.f32 %v705_v42, %v2280_v26  ;;  %v720_v20 = vsub.f32 %v712_v43, %v553_v37 }
  0xbe   : > { %v721_v46 = vsub.f32 %v713_v44, %v559_v38  ;;  %v733_v49 = vcombine.low %v718_v23, %v719_v45 }
  0xbf   : > { %v715_v11 = vadd.f32 %v707_v3, %v2285_v36  ;;  %v722_v50 = vsub.f32 %v714_v30, %v565_v52 }
  0xc0   : > { %v734_v53 = vcombine.low %v720_v20, %v721_v46  ;;  %v736_v54 = vrot.slane %v733_v49, 7 }
  0xc1   : > { %v723_v24 = vsub.f32 %v715_v11, %v571_v2 }
  0xc2   : > { %v737_v25 = vsel %vm422_vm10, %v736_v54, %v732_v48  ;;  %v740_v5 = vrot.slane %v734_v53, 6 }
  0xc3   : > { %v735_v31 = vcombine.low %v722_v50, %v723_v24  ;;  %v739_v55 = vsel %vm738_vm11, %v736_v54, %v737_v25 }
  0xc4   : > { %v741_v26 = vsel %vm425_vm12, %v740_v5, %v739_v55 }
  0xc5   : > { %v743_v56 = vsel %vm742_vm13, %v740_v5, %v741_v26  ;;  %v744_v57 = vrot.slane %v735_v31, 5 }
  0xc7   : > { %v745_v36 = vsel %vm428_vm14, %v744_v57, %v743_v56 }
  0xc8   : > { %v2351_v35 = vsel %vm746_vm15, %v744_v57, %v745_v36 }
  0xc9   : > { %v2356_v33 = vsel %vm277_vm1, 0.0, %v2351_v35 }
  0xca   : > { %v2360_v15 = vcombine.high %v2356_v33, %v2356_v33  ;;  %vm755_vm2 = vcmp.ge.s32.totalorder %v2356_v33, 1073741824 }
  0xcb   : > { %v757_v47 = vsel %vm755_vm2, 1, %v1989_v1 }
  0xcc   : > { %vm756_vm3 = vcmp.ge.s32.totalorder %v2360_v15, 1073741824  ;;  %v759_v58 = vsel %vm281_vm0, %v757_v47, 0 }
  0xcd   : > { %v758_v27 = vsel %vm756_vm3, 1, %v1989_v1 }
  0xce   : > { %v760_v60 = vsel %vm281_vm0, %v758_v27, 0 }
  0xcf   : > { %v761_v61 = vadd.s32 %v760_v60, %v759_v58 }
  0xd1   : > { %v763_v62 = vshrl.u32 %v761_v61, 16  ;;  %v762_v34 = vand.u32 65535, %v761_v61 }
  0xd3   : > { %v765_v39 = vcvt.s32.f32 %v763_v62  ;;  %v764_v4 = vcvt.s32.f32 %v762_v34 }
  0xd5   : > { %768 = vadd.xlane.f32.xlu1 %v765_v39 }
  0xd9   : > { %766 = vadd.xlane.f32.xlu1 %v764_v4 }
 0x10f   : > { %v292_v12 = vpop.xlane.xlu0 %291 }
 0x110   : > { %v294_v13 = vcvt.f32.s32 %v292_v12 }
 0x112   : > { %v295_v18 = vshll.u32 %v294_v13, 16 }
 0x117   : > { %v290_v7 = vpop.xlane.xlu0 %289 }
 0x118   : > { %v293_v9 = vcvt.f32.s32 %v290_v7 }
 0x11a   : > { %v2368_v10 = vadd.s32 %v295_v18, %v293_v9 }
 0x11c   : > { %v750_v29 = vmul.u32 3, %v2368_v10 }
 0x11e   : > { %vm751_vm4 = vcmp.lt.s32.totalorder %v750_v29, 255 }
 0x11f   : > { %v2371_v38 = vsel %vm751_vm4, %v750_v29, 255 }
 0x15e   : > { %v769_v16 = vpop.xlane.xlu1 %768 }
 0x15f   : > { %v771_v17 = vcvt.f32.s32 %v769_v16 }
 0x161   : > { %v772_v22 = vshll.u32 %v771_v17, 16 }
 0x162   : > { %v767_v21 = vpop.xlane.xlu1 %766 }
 0x163   : > { %v770_v28 = vcvt.f32.s32 %v767_v21 }
 0x165   : > { %v773_v37 = vadd.s32 %v772_v22, %v770_v28 }
 0x167   : > { %vm774_vm5 = vcmp.ge.s32.totalorder %v773_v37, %v2371_v38 }
 0x168   : > { %v775_v6 = vsel %vm774_vm5, 1073741824, %v1989_v1 }
 0x169   : > { %v776_v40 = vor.u32 536870912, %v775_v6 }
 0x16b   : > { %vm777_vm6 = vcmp.ge.s32.totalorder %v2356_v33, %v776_v40  ;;  %vm778_vm7 = vcmp.ge.s32.totalorder %v2360_v15, %v776_v40 }
 0x16c   : > { %v779_v41 = vsel %vm777_vm6, 1, %v1989_v1  ;;  %v780_v32 = vsel %vm778_vm7, 1, %v1989_v1 }
 0x16d   : > { %v781_v51 = vsel %vm281_vm0, %v779_v41, 0  ;;  %v782_v63 = vsel %vm281_vm0, %v780_v32, 0 }
 0x16e   : > { %v783_v23 = vadd.s32 %v782_v63, %v781_v51 }
 0x170   : > { %v785_v52 = vshrl.u32 %v783_v23, 16  ;;  %v784_v42 = vand.u32 65535, %v783_v23 }
 0x172   : > { %v787_v43 = vcvt.s32.f32 %v785_v52  ;;  %v786_v59 = vcvt.s32.f32 %v784_v42 }
 0x174   : > { %790 = vadd.xlane.f32.xlu0 %v787_v43  ;;  %788 = vadd.xlane.f32.xlu1 %v786_v59 }
 0x1fd   : > { %v791_v44 = vpop.xlane.xlu0 %790  ;;  %v789_v45 = vpop.xlane.xlu1 %788 }
 0x1fe   : > { %v793_v2 = vcvt.f32.s32 %v791_v44  ;;  %v792_v30 = vcvt.f32.s32 %v789_v45 }
 0x200   : > { %v794_v3 = vshll.u32 %v793_v2, 16 }
 0x202   : > { %v795_v20 = vadd.s32 %v794_v3, %v792_v30 }
 0x204   : > { %vm796_vm8 = vcmp.ge.s32.totalorder %v795_v20, %v2371_v38 }
 0x205   : > { %v797_v46 = vsel %vm796_vm8, %v776_v40, %v775_v6 }
 0x206   : > { %v798_v48 = vor.u32 268435456, %v797_v46 }
 0x208   : > { %vm799_vm9 = vcmp.ge.s32.totalorder %v2356_v33, %v798_v48  ;;  %vm800_vm11 = vcmp.ge.s32.totalorder %v2360_v15, %v798_v48 }
 0x209   : > { %v801_v49 = vsel %vm799_vm9, 1, %v1989_v1  ;;  %v802_v11 = vsel %vm800_vm11, 1, %v1989_v1 }
 0x20a   : > { %v803_v50 = vsel %vm281_vm0, %v801_v49, 0  ;;  %v804_v53 = vsel %vm281_vm0, %v802_v11, 0 }
 0x20b   : > { %v805_v54 = vadd.s32 %v804_v53, %v803_v50 }
 0x20d   : > { %v807_v24 = vshrl.u32 %v805_v54, 16  ;;  %v806_v25 = vand.u32 65535, %v805_v54 }
 0x20f   : > { %v809_v5 = vcvt.s32.f32 %v807_v24  ;;  %v808_v31 = vcvt.s32.f32 %v806_v25 }
 0x211   : > { %812 = vadd.xlane.f32.xlu0 %v809_v5  ;;  %810 = vadd.xlane.f32.xlu1 %v808_v31 }
 0x29a   : > { %v813_v55 = vpop.xlane.xlu0 %812  ;;  %v811_v26 = vpop.xlane.xlu1 %810 }
 0x29b   : > { %v815_v56 = vcvt.f32.s32 %v813_v55  ;;  %v814_v36 = vcvt.f32.s32 %v811_v26 }
 0x29d   : > { %v816_v57 = vshll.u32 %v815_v56, 16 }
 0x29f   : > { %v817_v47 = vadd.s32 %v816_v57, %v814_v36 }
 0x2a1   : > { %vm818_vm13 = vcmp.ge.s32.totalorder %v817_v47, %v2371_v38 }
 0x2a2   : > { %v819_v58 = vsel %vm818_vm13, %v798_v48, %v797_v46 }
 0x2a3   : > { %v820_v27 = vor.u32 134217728, %v819_v58 }
 0x2a5   : > { %vm821_vm15 = vcmp.ge.s32.totalorder %v2356_v33, %v820_v27  ;;  %vm822_vm2 = vcmp.ge.s32.totalorder %v2360_v15, %v820_v27 }
 0x2a6   : > { %v823_v60 = vsel %vm821_vm15, 1, %v1989_v1  ;;  %v824_v61 = vsel %vm822_vm2, 1, %v1989_v1 }
 0x2a7   : > { %v825_v62 = vsel %vm281_vm0, %v823_v60, 0  ;;  %v826_v34 = vsel %vm281_vm0, %v824_v61, 0 }
 0x2a8   : > { %v827_v39 = vadd.s32 %v826_v34, %v825_v62 }
 0x2aa   : > { %v829_v4 = vshrl.u32 %v827_v39, 16  ;;  %v828_v12 = vand.u32 65535, %v827_v39 }
 0x2ac   : > { %v831_v13 = vcvt.s32.f32 %v829_v4  ;;  %v830_v7 = vcvt.s32.f32 %v828_v12 }
 0x2ae   : > { %834 = vadd.xlane.f32.xlu0 %v831_v13  ;;  %832 = vadd.xlane.f32.xlu1 %v830_v7 }
 0x337   : > { %v835_v18 = vpop.xlane.xlu0 %834  ;;  %v833_v9 = vpop.xlane.xlu1 %832 }
 0x338   : > { %v837_v16 = vcvt.f32.s32 %v835_v18  ;;  %v836_v17 = vcvt.f32.s32 %v833_v9 }
 0x33a   : > { %v838_v29 = vshll.u32 %v837_v16, 16 }
 0x33c   : > { %v839_v21 = vadd.s32 %v838_v29, %v836_v17 }
 0x33e   : > { %vm840_vm3 = vcmp.ge.s32.totalorder %v839_v21, %v2371_v38 }
 0x33f   : > { %v841_v22 = vsel %vm840_vm3, %v820_v27, %v819_v58 }
 0x340   : > { %v842_v28 = vor.u32 67108864, %v841_v22 }
 0x342   : > { %vm843_vm4 = vcmp.ge.s32.totalorder %v2356_v33, %v842_v28  ;;  %vm844_vm5 = vcmp.ge.s32.totalorder %v2360_v15, %v842_v28 }
 0x343   : > { %v845_v37 = vsel %vm843_vm4, 1, %v1989_v1  ;;  %v846_v6 = vsel %vm844_vm5, 1, %v1989_v1 }
 0x344   : > { %v847_v40 = vsel %vm281_vm0, %v845_v37, 0  ;;  %v848_v41 = vsel %vm281_vm0, %v846_v6, 0 }
 0x345   : > { %v849_v32 = vadd.s32 %v848_v41, %v847_v40 }
 0x347   : > { %v851_v51 = vshrl.u32 %v849_v32, 16  ;;  %v850_v63 = vand.u32 65535, %v849_v32 }
 0x349   : > { %v853_v23 = vcvt.s32.f32 %v851_v51  ;;  %v852_v52 = vcvt.s32.f32 %v850_v63 }
 0x34b   : > { %856 = vadd.xlane.f32.xlu0 %v853_v23  ;;  %854 = vadd.xlane.f32.xlu1 %v852_v52 }
 0x3d4   : > { %v857_v42 = vpop.xlane.xlu0 %856  ;;  %v855_v43 = vpop.xlane.xlu1 %854 }
 0x3d5   : > { %v859_v59 = vcvt.f32.s32 %v857_v42  ;;  %v858_v45 = vcvt.f32.s32 %v855_v43 }
 0x3d7   : > { %v860_v44 = vshll.u32 %v859_v59, 16 }
 0x3d9   : > { %v861_v2 = vadd.s32 %v860_v44, %v858_v45 }
 0x3db   : > { %vm862_vm6 = vcmp.ge.s32.totalorder %v861_v2, %v2371_v38 }
 0x3dc   : > { %v863_v3 = vsel %vm862_vm6, %v842_v28, %v841_v22 }
 0x3dd   : > { %v864_v30 = vor.u32 33554432, %v863_v3 }
 0x3df   : > { %vm865_vm7 = vcmp.ge.s32.totalorder %v2356_v33, %v864_v30  ;;  %vm866_vm8 = vcmp.ge.s32.totalorder %v2360_v15, %v864_v30 }
 0x3e0   : > { %v867_v20 = vsel %vm865_vm7, 1, %v1989_v1  ;;  %v868_v46 = vsel %vm866_vm8, 1, %v1989_v1 }
 0x3e1   : > { %v869_v48 = vsel %vm281_vm0, %v867_v20, 0  ;;  %v870_v49 = vsel %vm281_vm0, %v868_v46, 0 }
 0x3e2   : > { %v871_v11 = vadd.s32 %v870_v49, %v869_v48 }
 0x3e4   : > { %v873_v50 = vshrl.u32 %v871_v11, 16  ;;  %v872_v53 = vand.u32 65535, %v871_v11 }
 0x3e6   : > { %v875_v54 = vcvt.s32.f32 %v873_v50  ;;  %v874_v24 = vcvt.s32.f32 %v872_v53 }
 0x3e8   : > { %878 = vadd.xlane.f32.xlu0 %v875_v54  ;;  %876 = vadd.xlane.f32.xlu1 %v874_v24 }
 0x471   : > { %v879_v25 = vpop.xlane.xlu0 %878  ;;  %v877_v5 = vpop.xlane.xlu1 %876 }
 0x472   : > { %v881_v31 = vcvt.f32.s32 %v879_v25  ;;  %v880_v26 = vcvt.f32.s32 %v877_v5 }
 0x474   : > { %v882_v55 = vshll.u32 %v881_v31, 16 }
 0x476   : > { %v883_v56 = vadd.s32 %v882_v55, %v880_v26 }
 0x478   : > { %vm884_vm9 = vcmp.ge.s32.totalorder %v883_v56, %v2371_v38 }
 0x479   : > { %v885_v57 = vsel %vm884_vm9, %v864_v30, %v863_v3 }
 0x47a   : > { %v886_v36 = vor.u32 16777216, %v885_v57 }
 0x47c   : > { %vm887_vm11 = vcmp.ge.s32.totalorder %v2356_v33, %v886_v36  ;;  %vm888_vm13 = vcmp.ge.s32.totalorder %v2360_v15, %v886_v36 }
 0x47d   : > { %v889_v47 = vsel %vm887_vm11, 1, %v1989_v1  ;;  %v890_v58 = vsel %vm888_vm13, 1, %v1989_v1 }
 0x47e   : > { %v891_v27 = vsel %vm281_vm0, %v889_v47, 0  ;;  %v892_v60 = vsel %vm281_vm0, %v890_v58, 0 }
 0x47f   : > { %v893_v61 = vadd.s32 %v892_v60, %v891_v27 }
 0x481   : > { %v895_v62 = vshrl.u32 %v893_v61, 16  ;;  %v894_v34 = vand.u32 65535, %v893_v61 }
 0x483   : > { %v897_v39 = vcvt.s32.f32 %v895_v62  ;;  %v896_v4 = vcvt.s32.f32 %v894_v34 }
 0x485   : > { %900 = vadd.xlane.f32.xlu0 %v897_v39  ;;  %898 = vadd.xlane.f32.xlu1 %v896_v4 }
 0x50e   : > { %v901_v12 = vpop.xlane.xlu0 %900  ;;  %v899_v13 = vpop.xlane.xlu1 %898 }
 0x50f   : > { %v903_v7 = vcvt.f32.s32 %v901_v12  ;;  %v902_v9 = vcvt.f32.s32 %v899_v13 }
 0x511   : > { %v904_v18 = vshll.u32 %v903_v7, 16 }
 0x513   : > { %v905_v16 = vadd.s32 %v904_v18, %v902_v9 }
 0x515   : > { %vm906_vm15 = vcmp.ge.s32.totalorder %v905_v16, %v2371_v38 }
 0x516   : > { %v907_v29 = vsel %vm906_vm15, %v886_v36, %v885_v57 }
 0x517   : > { %v908_v17 = vor.u32 8388608, %v907_v29 }
 0x519   : > { %vm909_vm2 = vcmp.ge.s32.totalorder %v2356_v33, %v908_v17  ;;  %vm910_vm3 = vcmp.ge.s32.totalorder %v2360_v15, %v908_v17 }
 0x51a   : > { %v911_v21 = vsel %vm909_vm2, 1, %v1989_v1  ;;  %v912_v22 = vsel %vm910_vm3, 1, %v1989_v1 }
 0x51b   : > { %v913_v28 = vsel %vm281_vm0, %v911_v21, 0  ;;  %v914_v37 = vsel %vm281_vm0, %v912_v22, 0 }
 0x51c   : > { %v915_v6 = vadd.s32 %v914_v37, %v913_v28 }
 0x51e   : > { %v917_v40 = vshrl.u32 %v915_v6, 16  ;;  %v916_v41 = vand.u32 65535, %v915_v6 }
 0x520   : > { %v919_v32 = vcvt.s32.f32 %v917_v40  ;;  %v918_v51 = vcvt.s32.f32 %v916_v41 }
 0x522   : > { %922 = vadd.xlane.f32.xlu0 %v919_v32  ;;  %920 = vadd.xlane.f32.xlu1 %v918_v51 }
 0x5ab   : > { %v923_v63 = vpop.xlane.xlu0 %922  ;;  %v921_v23 = vpop.xlane.xlu1 %920 }
 0x5ac   : > { %v925_v52 = vcvt.f32.s32 %v923_v63  ;;  %v924_v43 = vcvt.f32.s32 %v921_v23 }
 0x5ae   : > { %v926_v42 = vshll.u32 %v925_v52, 16 }
 0x5b0   : > { %v927_v59 = vadd.s32 %v926_v42, %v924_v43 }
 0x5b2   : > { %vm928_vm4 = vcmp.ge.s32.totalorder %v927_v59, %v2371_v38 }
 0x5b3   : > { %v929_v44 = vsel %vm928_vm4, %v908_v17, %v907_v29 }
 0x5b4   : > { %v930_v45 = vor.u32 4194304, %v929_v44 }
 0x5b6   : > { %vm931_vm5 = vcmp.ge.s32.totalorder %v2356_v33, %v930_v45  ;;  %vm932_vm6 = vcmp.ge.s32.totalorder %v2360_v15, %v930_v45 }
 0x5b7   : > { %v933_v2 = vsel %vm931_vm5, 1, %v1989_v1  ;;  %v934_v3 = vsel %vm932_vm6, 1, %v1989_v1 }
 0x5b8   : > { %v935_v30 = vsel %vm281_vm0, %v933_v2, 0  ;;  %v936_v20 = vsel %vm281_vm0, %v934_v3, 0 }
 0x5b9   : > { %v937_v46 = vadd.s32 %v936_v20, %v935_v30 }
 0x5bb   : > { %v939_v48 = vshrl.u32 %v937_v46, 16  ;;  %v938_v49 = vand.u32 65535, %v937_v46 }
 0x5bd   : > { %v941_v11 = vcvt.s32.f32 %v939_v48  ;;  %v940_v50 = vcvt.s32.f32 %v938_v49 }
 0x5bf   : > { %944 = vadd.xlane.f32.xlu0 %v941_v11  ;;  %942 = vadd.xlane.f32.xlu1 %v940_v50 }
 0x648   : > { %v945_v53 = vpop.xlane.xlu0 %944  ;;  %v943_v54 = vpop.xlane.xlu1 %942 }
 0x649   : > { %v947_v24 = vcvt.f32.s32 %v945_v53  ;;  %v946_v5 = vcvt.f32.s32 %v943_v54 }
 0x64b   : > { %v948_v25 = vshll.u32 %v947_v24, 16 }
 0x64d   : > { %v949_v31 = vadd.s32 %v948_v25, %v946_v5 }
 0x64f   : > { %vm950_vm7 = vcmp.ge.s32.totalorder %v949_v31, %v2371_v38 }
 0x650   : > { %v951_v55 = vsel %vm950_vm7, %v930_v45, %v929_v44 }
 0x651   : > { %v952_v26 = vor.u32 2097152, %v951_v55 }
 0x653   : > { %vm953_vm8 = vcmp.ge.s32.totalorder %v2356_v33, %v952_v26  ;;  %vm954_vm9 = vcmp.ge.s32.totalorder %v2360_v15, %v952_v26 }
 0x654   : > { %v955_v56 = vsel %vm953_vm8, 1, %v1989_v1  ;;  %v956_v57 = vsel %vm954_vm9, 1, %v1989_v1 }
 0x655   : > { %v957_v36 = vsel %vm281_vm0, %v955_v56, 0  ;;  %v958_v47 = vsel %vm281_vm0, %v956_v57, 0 }
 0x656   : > { %v959_v58 = vadd.s32 %v958_v47, %v957_v36 }
 0x658   : > { %v961_v27 = vshrl.u32 %v959_v58, 16  ;;  %v960_v60 = vand.u32 65535, %v959_v58 }
 0x65a   : > { %v963_v61 = vcvt.s32.f32 %v961_v27  ;;  %v962_v62 = vcvt.s32.f32 %v960_v60 }
 0x65c   : > { %966 = vadd.xlane.f32.xlu0 %v963_v61  ;;  %964 = vadd.xlane.f32.xlu1 %v962_v62 }
 0x6e5   : > { %v967_v34 = vpop.xlane.xlu0 %966  ;;  %v965_v39 = vpop.xlane.xlu1 %964 }
 0x6e6   : > { %v969_v4 = vcvt.f32.s32 %v967_v34  ;;  %v968_v13 = vcvt.f32.s32 %v965_v39 }
 0x6e8   : > { %v970_v12 = vshll.u32 %v969_v4, 16 }
 0x6ea   : > { %v971_v7 = vadd.s32 %v970_v12, %v968_v13 }
 0x6ec   : > { %vm972_vm11 = vcmp.ge.s32.totalorder %v971_v7, %v2371_v38 }
 0x6ed   : > { %v973_v18 = vsel %vm972_vm11, %v952_v26, %v951_v55 }
 0x6ee   : > { %v974_v9 = vor.u32 1048576, %v973_v18 }
 0x6f0   : > { %vm975_vm13 = vcmp.ge.s32.totalorder %v2356_v33, %v974_v9  ;;  %vm976_vm15 = vcmp.ge.s32.totalorder %v2360_v15, %v974_v9 }
 0x6f1   : > { %v977_v16 = vsel %vm975_vm13, 1, %v1989_v1  ;;  %v978_v29 = vsel %vm976_vm15, 1, %v1989_v1 }
 0x6f2   : > { %v979_v17 = vsel %vm281_vm0, %v977_v16, 0  ;;  %v980_v21 = vsel %vm281_vm0, %v978_v29, 0 }
 0x6f3   : > { %v981_v22 = vadd.s32 %v980_v21, %v979_v17 }
 0x6f5   : > { %v983_v28 = vshrl.u32 %v981_v22, 16  ;;  %v982_v37 = vand.u32 65535, %v981_v22 }
 0x6f7   : > { %v985_v6 = vcvt.s32.f32 %v983_v28  ;;  %v984_v40 = vcvt.s32.f32 %v982_v37 }
 0x6f9   : > { %988 = vadd.xlane.f32.xlu0 %v985_v6  ;;  %986 = vadd.xlane.f32.xlu1 %v984_v40 }
 0x782   : > { %v989_v41 = vpop.xlane.xlu0 %988  ;;  %v987_v32 = vpop.xlane.xlu1 %986 }
 0x783   : > { %v991_v51 = vcvt.f32.s32 %v989_v41  ;;  %v990_v23 = vcvt.f32.s32 %v987_v32 }
 0x785   : > { %v992_v63 = vshll.u32 %v991_v51, 16 }
 0x787   : > { %v993_v52 = vadd.s32 %v992_v63, %v990_v23 }
 0x789   : > { %vm994_vm2 = vcmp.ge.s32.totalorder %v993_v52, %v2371_v38 }
 0x78a   : > { %v995_v42 = vsel %vm994_vm2, %v974_v9, %v973_v18 }
 0x78b   : > { %v996_v43 = vor.u32 524288, %v995_v42 }
 0x78d   : > { %vm997_vm3 = vcmp.ge.s32.totalorder %v2356_v33, %v996_v43  ;;  %vm998_vm4 = vcmp.ge.s32.totalorder %v2360_v15, %v996_v43 }
 0x78e   : > { %v999_v59 = vsel %vm997_vm3, 1, %v1989_v1  ;;  %v1000_v44 = vsel %vm998_vm4, 1, %v1989_v1 }
 0x78f   : > { %v1001_v45 = vsel %vm281_vm0, %v999_v59, 0  ;;  %v1002_v2 = vsel %vm281_vm0, %v1000_v44, 0 }
 0x790   : > { %v1003_v3 = vadd.s32 %v1002_v2, %v1001_v45 }
 0x792   : > { %v1005_v30 = vshrl.u32 %v1003_v3, 16  ;;  %v1004_v20 = vand.u32 65535, %v1003_v3 }
 0x794   : > { %v1007_v46 = vcvt.s32.f32 %v1005_v30  ;;  %v1006_v48 = vcvt.s32.f32 %v1004_v20 }
 0x796   : > { %1010 = vadd.xlane.f32.xlu0 %v1007_v46  ;;  %1008 = vadd.xlane.f32.xlu1 %v1006_v48 }
 0x81f   : > { %v1011_v49 = vpop.xlane.xlu0 %1010  ;;  %v1009_v11 = vpop.xlane.xlu1 %1008 }
 0x820   : > { %v1013_v50 = vcvt.f32.s32 %v1011_v49  ;;  %v1012_v54 = vcvt.f32.s32 %v1009_v11 }
 0x822   : > { %v1014_v53 = vshll.u32 %v1013_v50, 16 }
 0x824   : > { %v1015_v24 = vadd.s32 %v1014_v53, %v1012_v54 }
 0x826   : > { %vm1016_vm5 = vcmp.ge.s32.totalorder %v1015_v24, %v2371_v38 }
 0x827   : > { %v1017_v25 = vsel %vm1016_vm5, %v996_v43, %v995_v42 }
 0x828   : > { %v1018_v5 = vor.u32 262144, %v1017_v25 }
 0x82a   : > { %vm1019_vm6 = vcmp.ge.s32.totalorder %v2356_v33, %v1018_v5  ;;  %vm1020_vm7 = vcmp.ge.s32.totalorder %v2360_v15, %v1018_v5 }
 0x82b   : > { %v1021_v31 = vsel %vm1019_vm6, 1, %v1989_v1  ;;  %v1022_v55 = vsel %vm1020_vm7, 1, %v1989_v1 }
 0x82c   : > { %v1023_v26 = vsel %vm281_vm0, %v1021_v31, 0  ;;  %v1024_v56 = vsel %vm281_vm0, %v1022_v55, 0 }
 0x82d   : > { %v1025_v57 = vadd.s32 %v1024_v56, %v1023_v26 }
 0x82f   : > { %v1027_v36 = vshrl.u32 %v1025_v57, 16  ;;  %v1026_v47 = vand.u32 65535, %v1025_v57 }
 0x831   : > { %v1029_v58 = vcvt.s32.f32 %v1027_v36  ;;  %v1028_v27 = vcvt.s32.f32 %v1026_v47 }
 0x833   : > { %1032 = vadd.xlane.f32.xlu0 %v1029_v58  ;;  %1030 = vadd.xlane.f32.xlu1 %v1028_v27 }
 0x8bc   : > { %v1033_v60 = vpop.xlane.xlu0 %1032  ;;  %v1031_v61 = vpop.xlane.xlu1 %1030 }
 0x8bd   : > { %v1035_v62 = vcvt.f32.s32 %v1033_v60  ;;  %v1034_v39 = vcvt.f32.s32 %v1031_v61 }
 0x8bf   : > { %v1036_v34 = vshll.u32 %v1035_v62, 16 }
 0x8c1   : > { %v1037_v4 = vadd.s32 %v1036_v34, %v1034_v39 }
 0x8c3   : > { %vm1038_vm8 = vcmp.ge.s32.totalorder %v1037_v4, %v2371_v38 }
 0x8c4   : > { %v1039_v12 = vsel %vm1038_vm8, %v1018_v5, %v1017_v25 }
 0x8c5   : > { %v1040_v13 = vor.u32 131072, %v1039_v12 }
 0x8c7   : > { %vm1041_vm9 = vcmp.ge.s32.totalorder %v2356_v33, %v1040_v13  ;;  %vm1042_vm11 = vcmp.ge.s32.totalorder %v2360_v15, %v1040_v13 }
 0x8c8   : > { %v1043_v7 = vsel %vm1041_vm9, 1, %v1989_v1  ;;  %v1044_v18 = vsel %vm1042_vm11, 1, %v1989_v1 }
 0x8c9   : > { %v1045_v9 = vsel %vm281_vm0, %v1043_v7, 0  ;;  %v1046_v16 = vsel %vm281_vm0, %v1044_v18, 0 }
 0x8ca   : > { %v1047_v29 = vadd.s32 %v1046_v16, %v1045_v9 }
 0x8cc   : > { %v1049_v17 = vshrl.u32 %v1047_v29, 16  ;;  %v1048_v21 = vand.u32 65535, %v1047_v29 }
 0x8ce   : > { %v1051_v22 = vcvt.s32.f32 %v1049_v17  ;;  %v1050_v28 = vcvt.s32.f32 %v1048_v21 }
 0x8d0   : > { %1054 = vadd.xlane.f32.xlu0 %v1051_v22  ;;  %1052 = vadd.xlane.f32.xlu1 %v1050_v28 }
 0x959   : > { %v1055_v37 = vpop.xlane.xlu0 %1054  ;;  %v1053_v6 = vpop.xlane.xlu1 %1052 }
 0x95a   : > { %v1057_v40 = vcvt.f32.s32 %v1055_v37  ;;  %v1056_v32 = vcvt.f32.s32 %v1053_v6 }
 0x95c   : > { %v1058_v41 = vshll.u32 %v1057_v40, 16 }
 0x95e   : > { %v1059_v51 = vadd.s32 %v1058_v41, %v1056_v32 }
 0x960   : > { %vm1060_vm13 = vcmp.ge.s32.totalorder %v1059_v51, %v2371_v38 }
 0x961   : > { %v1061_v63 = vsel %vm1060_vm13, %v1040_v13, %v1039_v12 }
 0x962   : > { %v1062_v23 = vor.u32 65536, %v1061_v63 }
 0x964   : > { %vm1063_vm15 = vcmp.ge.s32.totalorder %v2356_v33, %v1062_v23  ;;  %vm1064_vm2 = vcmp.ge.s32.totalorder %v2360_v15, %v1062_v23 }
 0x965   : > { %v1065_v52 = vsel %vm1063_vm15, 1, %v1989_v1  ;;  %v1066_v42 = vsel %vm1064_vm2, 1, %v1989_v1 }
 0x966   : > { %v1067_v43 = vsel %vm281_vm0, %v1065_v52, 0  ;;  %v1068_v59 = vsel %vm281_vm0, %v1066_v42, 0 }
 0x967   : > { %v1069_v44 = vadd.s32 %v1068_v59, %v1067_v43 }
 0x969   : > { %v1071_v45 = vshrl.u32 %v1069_v44, 16  ;;  %v1070_v2 = vand.u32 65535, %v1069_v44 }
 0x96b   : > { %v1073_v3 = vcvt.s32.f32 %v1071_v45  ;;  %v1072_v30 = vcvt.s32.f32 %v1070_v2 }
 0x96d   : > { %1076 = vadd.xlane.f32.xlu0 %v1073_v3  ;;  %1074 = vadd.xlane.f32.xlu1 %v1072_v30 }
 0x9f6   : > { %v1077_v20 = vpop.xlane.xlu0 %1076  ;;  %v1075_v46 = vpop.xlane.xlu1 %1074 }
 0x9f7   : > { %v1079_v48 = vcvt.f32.s32 %v1077_v20  ;;  %v1078_v11 = vcvt.f32.s32 %v1075_v46 }
 0x9f9   : > { %v1080_v49 = vshll.u32 %v1079_v48, 16 }
 0x9fb   : > { %v1081_v50 = vadd.s32 %v1080_v49, %v1078_v11 }
 0x9fd   : > { %vm1082_vm3 = vcmp.ge.s32.totalorder %v1081_v50, %v2371_v38 }
 0x9fe   : > { %v1083_v53 = vsel %vm1082_vm3, %v1062_v23, %v1061_v63 }
 0x9ff   : > { %v1084_v54 = vor.u32 32768, %v1083_v53 }
 0xa01   : > { %vm1085_vm4 = vcmp.ge.s32.totalorder %v2356_v33, %v1084_v54  ;;  %vm1086_vm5 = vcmp.ge.s32.totalorder %v2360_v15, %v1084_v54 }
 0xa02   : > { %v1087_v24 = vsel %vm1085_vm4, 1, %v1989_v1  ;;  %v1088_v25 = vsel %vm1086_vm5, 1, %v1989_v1 }
 0xa03   : > { %v1089_v5 = vsel %vm281_vm0, %v1087_v24, 0  ;;  %v1090_v31 = vsel %vm281_vm0, %v1088_v25, 0 }
 0xa04   : > { %v1091_v55 = vadd.s32 %v1090_v31, %v1089_v5 }
 0xa06   : > { %v1093_v26 = vshrl.u32 %v1091_v55, 16  ;;  %v1092_v56 = vand.u32 65535, %v1091_v55 }
 0xa08   : > { %v1095_v57 = vcvt.s32.f32 %v1093_v26  ;;  %v1094_v36 = vcvt.s32.f32 %v1092_v56 }
 0xa0a   : > { %1098 = vadd.xlane.f32.xlu0 %v1095_v57  ;;  %1096 = vadd.xlane.f32.xlu1 %v1094_v36 }
 0xa93   : > { %v1099_v47 = vpop.xlane.xlu0 %1098  ;;  %v1097_v58 = vpop.xlane.xlu1 %1096 }
 0xa94   : > { %v1101_v27 = vcvt.f32.s32 %v1099_v47  ;;  %v1100_v61 = vcvt.f32.s32 %v1097_v58 }
 0xa96   : > { %v1102_v60 = vshll.u32 %v1101_v27, 16 }
 0xa98   : > { %v1103_v62 = vadd.s32 %v1102_v60, %v1100_v61 }
 0xa9a   : > { %vm1104_vm6 = vcmp.ge.s32.totalorder %v1103_v62, %v2371_v38 }
 0xa9b   : > { %v1105_v34 = vsel %vm1104_vm6, %v1084_v54, %v1083_v53 }
 0xa9c   : > { %v1106_v39 = vor.u32 16384, %v1105_v34 }
 0xa9e   : > { %vm1107_vm7 = vcmp.ge.s32.totalorder %v2356_v33, %v1106_v39  ;;  %vm1108_vm8 = vcmp.ge.s32.totalorder %v2360_v15, %v1106_v39 }
 0xa9f   : > { %v1109_v4 = vsel %vm1107_vm7, 1, %v1989_v1  ;;  %v1110_v12 = vsel %vm1108_vm8, 1, %v1989_v1 }
 0xaa0   : > { %v1111_v13 = vsel %vm281_vm0, %v1109_v4, 0  ;;  %v1112_v7 = vsel %vm281_vm0, %v1110_v12, 0 }
 0xaa1   : > { %v1113_v18 = vadd.s32 %v1112_v7, %v1111_v13 }
 0xaa3   : > { %v1115_v9 = vshrl.u32 %v1113_v18, 16  ;;  %v1114_v16 = vand.u32 65535, %v1113_v18 }
 0xaa5   : > { %v1117_v29 = vcvt.s32.f32 %v1115_v9  ;;  %v1116_v17 = vcvt.s32.f32 %v1114_v16 }
 0xaa7   : > { %1120 = vadd.xlane.f32.xlu0 %v1117_v29  ;;  %1118 = vadd.xlane.f32.xlu1 %v1116_v17 }
 0xb30   : > { %v1121_v21 = vpop.xlane.xlu0 %1120  ;;  %v1119_v22 = vpop.xlane.xlu1 %1118 }
 0xb31   : > { %v1123_v28 = vcvt.f32.s32 %v1121_v21  ;;  %v1122_v6 = vcvt.f32.s32 %v1119_v22 }
 0xb33   : > { %v1124_v37 = vshll.u32 %v1123_v28, 16 }
 0xb35   : > { %v1125_v40 = vadd.s32 %v1124_v37, %v1122_v6 }
 0xb37   : > { %vm1126_vm9 = vcmp.ge.s32.totalorder %v1125_v40, %v2371_v38 }
 0xb38   : > { %v1127_v41 = vsel %vm1126_vm9, %v1106_v39, %v1105_v34 }
 0xb39   : > { %v1128_v32 = vor.u32 8192, %v1127_v41 }
 0xb3b   : > { %vm1129_vm11 = vcmp.ge.s32.totalorder %v2356_v33, %v1128_v32  ;;  %vm1130_vm13 = vcmp.ge.s32.totalorder %v2360_v15, %v1128_v32 }
 0xb3c   : > { %v1131_v51 = vsel %vm1129_vm11, 1, %v1989_v1  ;;  %v1132_v63 = vsel %vm1130_vm13, 1, %v1989_v1 }
 0xb3d   : > { %v1133_v23 = vsel %vm281_vm0, %v1131_v51, 0  ;;  %v1134_v52 = vsel %vm281_vm0, %v1132_v63, 0 }
 0xb3e   : > { %v1135_v42 = vadd.s32 %v1134_v52, %v1133_v23 }
 0xb40   : > { %v1137_v43 = vshrl.u32 %v1135_v42, 16  ;;  %v1136_v59 = vand.u32 65535, %v1135_v42 }
 0xb42   : > { %v1139_v44 = vcvt.s32.f32 %v1137_v43  ;;  %v1138_v45 = vcvt.s32.f32 %v1136_v59 }
 0xb44   : > { %1142 = vadd.xlane.f32.xlu0 %v1139_v44  ;;  %1140 = vadd.xlane.f32.xlu1 %v1138_v45 }
 0xbcd   : > { %v1143_v2 = vpop.xlane.xlu0 %1142  ;;  %v1141_v3 = vpop.xlane.xlu1 %1140 }
 0xbce   : > { %v1145_v30 = vcvt.f32.s32 %v1143_v2  ;;  %v1144_v46 = vcvt.f32.s32 %v1141_v3 }
 0xbd0   : > { %v1146_v20 = vshll.u32 %v1145_v30, 16 }
 0xbd2   : > { %v1147_v48 = vadd.s32 %v1146_v20, %v1144_v46 }
 0xbd4   : > { %vm1148_vm15 = vcmp.ge.s32.totalorder %v1147_v48, %v2371_v38 }
 0xbd5   : > { %v1149_v49 = vsel %vm1148_vm15, %v1128_v32, %v1127_v41 }
 0xbd6   : > { %v1150_v11 = vor.u32 4096, %v1149_v49 }
 0xbd8   : > { %vm1151_vm2 = vcmp.ge.s32.totalorder %v2356_v33, %v1150_v11  ;;  %vm1152_vm3 = vcmp.ge.s32.totalorder %v2360_v15, %v1150_v11 }
 0xbd9   : > { %v1153_v50 = vsel %vm1151_vm2, 1, %v1989_v1  ;;  %v1154_v53 = vsel %vm1152_vm3, 1, %v1989_v1 }
 0xbda   : > { %v1155_v54 = vsel %vm281_vm0, %v1153_v50, 0  ;;  %v1156_v24 = vsel %vm281_vm0, %v1154_v53, 0 }
 0xbdb   : > { %v1157_v25 = vadd.s32 %v1156_v24, %v1155_v54 }
 0xbdd   : > { %v1159_v5 = vshrl.u32 %v1157_v25, 16  ;;  %v1158_v31 = vand.u32 65535, %v1157_v25 }
 0xbdf   : > { %v1161_v55 = vcvt.s32.f32 %v1159_v5  ;;  %v1160_v26 = vcvt.s32.f32 %v1158_v31 }
 0xbe1   : > { %1164 = vadd.xlane.f32.xlu0 %v1161_v55  ;;  %1162 = vadd.xlane.f32.xlu1 %v1160_v26 }
 0xc6a   : > { %v1165_v56 = vpop.xlane.xlu0 %1164  ;;  %v1163_v57 = vpop.xlane.xlu1 %1162 }
 0xc6b   : > { %v1167_v36 = vcvt.f32.s32 %v1165_v56  ;;  %v1166_v58 = vcvt.f32.s32 %v1163_v57 }
 0xc6d   : > { %v1168_v47 = vshll.u32 %v1167_v36, 16 }
 0xc6f   : > { %v1169_v27 = vadd.s32 %v1168_v47, %v1166_v58 }
 0xc71   : > { %vm1170_vm4 = vcmp.ge.s32.totalorder %v1169_v27, %v2371_v38 }
 0xc72   : > { %v1171_v60 = vsel %vm1170_vm4, %v1150_v11, %v1149_v49 }
 0xc73   : > { %v1172_v61 = vor.u32 2048, %v1171_v60 }
 0xc75   : > { %vm1173_vm5 = vcmp.ge.s32.totalorder %v2356_v33, %v1172_v61  ;;  %vm1174_vm6 = vcmp.ge.s32.totalorder %v2360_v15, %v1172_v61 }
 0xc76   : > { %v1175_v62 = vsel %vm1173_vm5, 1, %v1989_v1  ;;  %v1176_v34 = vsel %vm1174_vm6, 1, %v1989_v1 }
 0xc77   : > { %v1177_v39 = vsel %vm281_vm0, %v1175_v62, 0  ;;  %v1178_v4 = vsel %vm281_vm0, %v1176_v34, 0 }
 0xc78   : > { %v1179_v12 = vadd.s32 %v1178_v4, %v1177_v39 }
 0xc7a   : > { %v1181_v13 = vshrl.u32 %v1179_v12, 16  ;;  %v1180_v7 = vand.u32 65535, %v1179_v12 }
 0xc7c   : > { %v1183_v18 = vcvt.s32.f32 %v1181_v13  ;;  %v1182_v9 = vcvt.s32.f32 %v1180_v7 }
 0xc7e   : > { %1186 = vadd.xlane.f32.xlu0 %v1183_v18  ;;  %1184 = vadd.xlane.f32.xlu1 %v1182_v9 }
 0xd07   : > { %v1187_v16 = vpop.xlane.xlu0 %1186  ;;  %v1185_v29 = vpop.xlane.xlu1 %1184 }
 0xd08   : > { %v1189_v17 = vcvt.f32.s32 %v1187_v16  ;;  %v1188_v22 = vcvt.f32.s32 %v1185_v29 }
 0xd0a   : > { %v1190_v21 = vshll.u32 %v1189_v17, 16 }
 0xd0c   : > { %v1191_v28 = vadd.s32 %v1190_v21, %v1188_v22 }
 0xd0e   : > { %vm1192_vm7 = vcmp.ge.s32.totalorder %v1191_v28, %v2371_v38 }
 0xd0f   : > { %v1193_v37 = vsel %vm1192_vm7, %v1172_v61, %v1171_v60 }
 0xd10   : > { %v1194_v6 = vor.u32 1024, %v1193_v37 }
 0xd12   : > { %vm1195_vm8 = vcmp.ge.s32.totalorder %v2356_v33, %v1194_v6  ;;  %vm1196_vm9 = vcmp.ge.s32.totalorder %v2360_v15, %v1194_v6 }
 0xd13   : > { %v1197_v40 = vsel %vm1195_vm8, 1, %v1989_v1  ;;  %v1198_v41 = vsel %vm1196_vm9, 1, %v1989_v1 }
 0xd14   : > { %v1199_v32 = vsel %vm281_vm0, %v1197_v40, 0  ;;  %v1200_v51 = vsel %vm281_vm0, %v1198_v41, 0 }
 0xd15   : > { %v1201_v63 = vadd.s32 %v1200_v51, %v1199_v32 }
 0xd17   : > { %v1203_v23 = vshrl.u32 %v1201_v63, 16  ;;  %v1202_v52 = vand.u32 65535, %v1201_v63 }
 0xd19   : > { %v1205_v42 = vcvt.s32.f32 %v1203_v23  ;;  %v1204_v43 = vcvt.s32.f32 %v1202_v52 }
 0xd1b   : > { %1208 = vadd.xlane.f32.xlu0 %v1205_v42  ;;  %1206 = vadd.xlane.f32.xlu1 %v1204_v43 }
 0xda4   : > { %v1209_v59 = vpop.xlane.xlu0 %1208  ;;  %v1207_v44 = vpop.xlane.xlu1 %1206 }
 0xda5   : > { %v1211_v45 = vcvt.f32.s32 %v1209_v59  ;;  %v1210_v3 = vcvt.f32.s32 %v1207_v44 }
 0xda7   : > { %v1212_v2 = vshll.u32 %v1211_v45, 16 }
 0xda9   : > { %v1213_v30 = vadd.s32 %v1212_v2, %v1210_v3 }
 0xdab   : > { %vm1214_vm11 = vcmp.ge.s32.totalorder %v1213_v30, %v2371_v38 }
 0xdac   : > { %v1215_v20 = vsel %vm1214_vm11, %v1194_v6, %v1193_v37 }
 0xdad   : > { %v1216_v46 = vor.u32 512, %v1215_v20 }
 0xdaf   : > { %vm1217_vm13 = vcmp.ge.s32.totalorder %v2356_v33, %v1216_v46  ;;  %vm1218_vm15 = vcmp.ge.s32.totalorder %v2360_v15, %v1216_v46 }
 0xdb0   : > { %v1219_v48 = vsel %vm1217_vm13, 1, %v1989_v1  ;;  %v1220_v49 = vsel %vm1218_vm15, 1, %v1989_v1 }
 0xdb1   : > { %v1221_v11 = vsel %vm281_vm0, %v1219_v48, 0  ;;  %v1222_v50 = vsel %vm281_vm0, %v1220_v49, 0 }
 0xdb2   : > { %v1223_v53 = vadd.s32 %v1222_v50, %v1221_v11 }
 0xdb4   : > { %v1225_v54 = vshrl.u32 %v1223_v53, 16  ;;  %v1224_v24 = vand.u32 65535, %v1223_v53 }
 0xdb6   : > { %v1227_v25 = vcvt.s32.f32 %v1225_v54  ;;  %v1226_v5 = vcvt.s32.f32 %v1224_v24 }
 0xdb8   : > { %1230 = vadd.xlane.f32.xlu0 %v1227_v25  ;;  %1228 = vadd.xlane.f32.xlu1 %v1226_v5 }
 0xe41   : > { %v1231_v31 = vpop.xlane.xlu0 %1230  ;;  %v1229_v55 = vpop.xlane.xlu1 %1228 }
 0xe42   : > { %v1233_v26 = vcvt.f32.s32 %v1231_v31  ;;  %v1232_v57 = vcvt.f32.s32 %v1229_v55 }
 0xe44   : > { %v1234_v56 = vshll.u32 %v1233_v26, 16 }
 0xe46   : > { %v1235_v36 = vadd.s32 %v1234_v56, %v1232_v57 }
 0xe48   : > { %vm1236_vm2 = vcmp.ge.s32.totalorder %v1235_v36, %v2371_v38 }
 0xe49   : > { %v1237_v47 = vsel %vm1236_vm2, %v1216_v46, %v1215_v20 }
 0xe4a   : > { %v1238_v58 = vor.u32 256, %v1237_v47 }
 0xe4c   : > { %vm1239_vm3 = vcmp.ge.s32.totalorder %v2356_v33, %v1238_v58  ;;  %vm1240_vm4 = vcmp.ge.s32.totalorder %v2360_v15, %v1238_v58 }
 0xe4d   : > { %v1241_v27 = vsel %vm1239_vm3, 1, %v1989_v1  ;;  %v1242_v60 = vsel %vm1240_vm4, 1, %v1989_v1 }
 0xe4e   : > { %v1243_v61 = vsel %vm281_vm0, %v1241_v27, 0  ;;  %v1244_v62 = vsel %vm281_vm0, %v1242_v60, 0 }
 0xe4f   : > { %v1245_v34 = vadd.s32 %v1244_v62, %v1243_v61 }
 0xe51   : > { %v1247_v39 = vshrl.u32 %v1245_v34, 16  ;;  %v1246_v4 = vand.u32 65535, %v1245_v34 }
 0xe53   : > { %v1249_v12 = vcvt.s32.f32 %v1247_v39  ;;  %v1248_v13 = vcvt.s32.f32 %v1246_v4 }
 0xe55   : > { %1252 = vadd.xlane.f32.xlu0 %v1249_v12  ;;  %1250 = vadd.xlane.f32.xlu1 %v1248_v13 }
 0xede   : > { %v1253_v7 = vpop.xlane.xlu0 %1252  ;;  %v1251_v18 = vpop.xlane.xlu1 %1250 }
 0xedf   : > { %v1255_v9 = vcvt.f32.s32 %v1253_v7  ;;  %v1254_v29 = vcvt.f32.s32 %v1251_v18 }
 0xee1   : > { %v1256_v16 = vshll.u32 %v1255_v9, 16 }
 0xee3   : > { %v1257_v17 = vadd.s32 %v1256_v16, %v1254_v29 }
 0xee5   : > { %vm1258_vm5 = vcmp.ge.s32.totalorder %v1257_v17, %v2371_v38 }
 0xee6   : > { %v1259_v21 = vsel %vm1258_vm5, %v1238_v58, %v1237_v47 }
 0xee7   : > { %v1260_v22 = vor.u32 128, %v1259_v21 }
 0xee9   : > { %vm1261_vm6 = vcmp.ge.s32.totalorder %v2356_v33, %v1260_v22  ;;  %vm1262_vm7 = vcmp.ge.s32.totalorder %v2360_v15, %v1260_v22 }
 0xeea   : > { %v1263_v28 = vsel %vm1261_vm6, 1, %v1989_v1  ;;  %v1264_v37 = vsel %vm1262_vm7, 1, %v1989_v1 }
 0xeeb   : > { %v1265_v6 = vsel %vm281_vm0, %v1263_v28, 0  ;;  %v1266_v40 = vsel %vm281_vm0, %v1264_v37, 0 }
 0xeec   : > { %v1267_v41 = vadd.s32 %v1266_v40, %v1265_v6 }
 0xeee   : > { %v1269_v32 = vshrl.u32 %v1267_v41, 16  ;;  %v1268_v51 = vand.u32 65535, %v1267_v41 }
 0xef0   : > { %v1271_v63 = vcvt.s32.f32 %v1269_v32  ;;  %v1270_v23 = vcvt.s32.f32 %v1268_v51 }
 0xef2   : > { %1274 = vadd.xlane.f32.xlu0 %v1271_v63  ;;  %1272 = vadd.xlane.f32.xlu1 %v1270_v23 }
 0xf7b   : > { %v1275_v52 = vpop.xlane.xlu0 %1274  ;;  %v1273_v42 = vpop.xlane.xlu1 %1272 }
 0xf7c   : > { %v1277_v43 = vcvt.f32.s32 %v1275_v52  ;;  %v1276_v44 = vcvt.f32.s32 %v1273_v42 }
 0xf7e   : > { %v1278_v59 = vshll.u32 %v1277_v43, 16 }
 0xf80   : > { %v1279_v45 = vadd.s32 %v1278_v59, %v1276_v44 }
 0xf82   : > { %vm1280_vm8 = vcmp.ge.s32.totalorder %v1279_v45, %v2371_v38 }
 0xf83   : > { %v1281_v2 = vsel %vm1280_vm8, %v1260_v22, %v1259_v21 }
 0xf84   : > { %v1282_v3 = vor.u32 64, %v1281_v2 }
 0xf86   : > { %vm1283_vm9 = vcmp.ge.s32.totalorder %v2356_v33, %v1282_v3  ;;  %vm1284_vm11 = vcmp.ge.s32.totalorder %v2360_v15, %v1282_v3 }
 0xf87   : > { %v1285_v30 = vsel %vm1283_vm9, 1, %v1989_v1  ;;  %v1286_v20 = vsel %vm1284_vm11, 1, %v1989_v1 }
 0xf88   : > { %v1287_v46 = vsel %vm281_vm0, %v1285_v30, 0  ;;  %v1288_v48 = vsel %vm281_vm0, %v1286_v20, 0 }
 0xf89   : > { %v1289_v49 = vadd.s32 %v1288_v48, %v1287_v46 }
 0xf8b   : > { %v1291_v11 = vshrl.u32 %v1289_v49, 16  ;;  %v1290_v50 = vand.u32 65535, %v1289_v49 }
 0xf8d   : > { %v1293_v53 = vcvt.s32.f32 %v1291_v11  ;;  %v1292_v54 = vcvt.s32.f32 %v1290_v50 }
 0xf8f   : > { %1296 = vadd.xlane.f32.xlu0 %v1293_v53  ;;  %1294 = vadd.xlane.f32.xlu1 %v1292_v54 }
0x1018   : > { %v1297_v24 = vpop.xlane.xlu0 %1296  ;;  %v1295_v25 = vpop.xlane.xlu1 %1294 }
0x1019   : > { %v1299_v5 = vcvt.f32.s32 %v1297_v24  ;;  %v1298_v55 = vcvt.f32.s32 %v1295_v25 }
0x101b   : > { %v1300_v31 = vshll.u32 %v1299_v5, 16 }
0x101d   : > { %v1301_v26 = vadd.s32 %v1300_v31, %v1298_v55 }
0x101f   : > { %vm1302_vm13 = vcmp.ge.s32.totalorder %v1301_v26, %v2371_v38 }
0x1020   : > { %v1303_v56 = vsel %vm1302_vm13, %v1282_v3, %v1281_v2 }
0x1021   : > { %v1304_v57 = vor.u32 32, %v1303_v56 }
0x1023   : > { %vm1305_vm15 = vcmp.ge.s32.totalorder %v2356_v33, %v1304_v57  ;;  %vm1306_vm2 = vcmp.ge.s32.totalorder %v2360_v15, %v1304_v57 }
0x1024   : > { %v1307_v36 = vsel %vm1305_vm15, 1, %v1989_v1  ;;  %v1308_v47 = vsel %vm1306_vm2, 1, %v1989_v1 }
0x1025   : > { %v1309_v58 = vsel %vm281_vm0, %v1307_v36, 0  ;;  %v1310_v27 = vsel %vm281_vm0, %v1308_v47, 0 }
0x1026   : > { %v1311_v60 = vadd.s32 %v1310_v27, %v1309_v58 }
0x1028   : > { %v1313_v61 = vshrl.u32 %v1311_v60, 16  ;;  %v1312_v62 = vand.u32 65535, %v1311_v60 }
0x102a   : > { %v1315_v34 = vcvt.s32.f32 %v1313_v61  ;;  %v1314_v39 = vcvt.s32.f32 %v1312_v62 }
0x102c   : > { %1318 = vadd.xlane.f32.xlu0 %v1315_v34  ;;  %1316 = vadd.xlane.f32.xlu1 %v1314_v39 }
0x10b5   : > { %v1319_v4 = vpop.xlane.xlu0 %1318  ;;  %v1317_v12 = vpop.xlane.xlu1 %1316 }
0x10b6   : > { %v1321_v13 = vcvt.f32.s32 %v1319_v4  ;;  %v1320_v18 = vcvt.f32.s32 %v1317_v12 }
0x10b8   : > { %v1322_v7 = vshll.u32 %v1321_v13, 16 }
0x10ba   : > { %v1323_v9 = vadd.s32 %v1322_v7, %v1320_v18 }
0x10bc   : > { %vm1324_vm3 = vcmp.ge.s32.totalorder %v1323_v9, %v2371_v38 }
0x10bd   : > { %v1325_v16 = vsel %vm1324_vm3, %v1304_v57, %v1303_v56 }
0x10be   : > { %v1326_v29 = vor.u32 16, %v1325_v16 }
0x10c0   : > { %vm1327_vm4 = vcmp.ge.s32.totalorder %v2356_v33, %v1326_v29  ;;  %vm1328_vm5 = vcmp.ge.s32.totalorder %v2360_v15, %v1326_v29 }
0x10c1   : > { %v1329_v17 = vsel %vm1327_vm4, 1, %v1989_v1  ;;  %v1330_v21 = vsel %vm1328_vm5, 1, %v1989_v1 }
0x10c2   : > { %v1331_v22 = vsel %vm281_vm0, %v1329_v17, 0  ;;  %v1332_v28 = vsel %vm281_vm0, %v1330_v21, 0 }
0x10c3   : > { %v1333_v37 = vadd.s32 %v1332_v28, %v1331_v22 }
0x10c5   : > { %v1335_v6 = vshrl.u32 %v1333_v37, 16  ;;  %v1334_v40 = vand.u32 65535, %v1333_v37 }
0x10c7   : > { %v1337_v41 = vcvt.s32.f32 %v1335_v6  ;;  %v1336_v32 = vcvt.s32.f32 %v1334_v40 }
0x10c9   : > { %1340 = vadd.xlane.f32.xlu0 %v1337_v41  ;;  %1338 = vadd.xlane.f32.xlu1 %v1336_v32 }
0x1152   : > { %v1341_v51 = vpop.xlane.xlu0 %1340  ;;  %v1339_v63 = vpop.xlane.xlu1 %1338 }
0x1153   : > { %v1343_v23 = vcvt.f32.s32 %v1341_v51  ;;  %v1342_v42 = vcvt.f32.s32 %v1339_v63 }
0x1155   : > { %v1344_v52 = vshll.u32 %v1343_v23, 16 }
0x1157   : > { %v1345_v43 = vadd.s32 %v1344_v52, %v1342_v42 }
0x1159   : > { %vm1346_vm6 = vcmp.ge.s32.totalorder %v1345_v43, %v2371_v38 }
0x115a   : > { %v1347_v59 = vsel %vm1346_vm6, %v1326_v29, %v1325_v16 }
0x115b   : > { %v1348_v44 = vor.u32 8, %v1347_v59 }
0x115d   : > { %vm1349_vm7 = vcmp.ge.s32.totalorder %v2356_v33, %v1348_v44  ;;  %vm1350_vm8 = vcmp.ge.s32.totalorder %v2360_v15, %v1348_v44 }
0x115e   : > { %v1351_v45 = vsel %vm1349_vm7, 1, %v1989_v1  ;;  %v1352_v2 = vsel %vm1350_vm8, 1, %v1989_v1 }
0x115f   : > { %v1353_v3 = vsel %vm281_vm0, %v1351_v45, 0  ;;  %v1354_v30 = vsel %vm281_vm0, %v1352_v2, 0 }
0x1160   : > { %v1355_v20 = vadd.s32 %v1354_v30, %v1353_v3 }
0x1162   : > { %v1357_v46 = vshrl.u32 %v1355_v20, 16  ;;  %v1356_v48 = vand.u32 65535, %v1355_v20 }
0x1164   : > { %v1359_v49 = vcvt.s32.f32 %v1357_v46  ;;  %v1358_v11 = vcvt.s32.f32 %v1356_v48 }
0x1166   : > { %1362 = vadd.xlane.f32.xlu0 %v1359_v49  ;;  %1360 = vadd.xlane.f32.xlu1 %v1358_v11 }
0x11ef   : > { %v1363_v50 = vpop.xlane.xlu0 %1362  ;;  %v1361_v53 = vpop.xlane.xlu1 %1360 }
0x11f0   : > { %v1365_v54 = vcvt.f32.s32 %v1363_v50  ;;  %v1364_v25 = vcvt.f32.s32 %v1361_v53 }
0x11f2   : > { %v1366_v24 = vshll.u32 %v1365_v54, 16 }
0x11f4   : > { %v1367_v5 = vadd.s32 %v1366_v24, %v1364_v25 }
0x11f6   : > { %vm1368_vm9 = vcmp.ge.s32.totalorder %v1367_v5, %v2371_v38 }
0x11f7   : > { %v1369_v31 = vsel %vm1368_vm9, %v1348_v44, %v1347_v59 }
0x11f8   : > { %v1370_v55 = vor.u32 4, %v1369_v31 }
0x11fa   : > { %vm1371_vm11 = vcmp.ge.s32.totalorder %v2356_v33, %v1370_v55  ;;  %vm1372_vm13 = vcmp.ge.s32.totalorder %v2360_v15, %v1370_v55 }
0x11fb   : > { %v1373_v26 = vsel %vm1371_vm11, 1, %v1989_v1  ;;  %v1374_v56 = vsel %vm1372_vm13, 1, %v1989_v1 }
0x11fc   : > { %v1375_v57 = vsel %vm281_vm0, %v1373_v26, 0  ;;  %v1376_v36 = vsel %vm281_vm0, %v1374_v56, 0  ;;  %v1991_v56 = vmov 839922192  }
0x11fd   : > { %v1377_v47 = vadd.s32 %v1376_v36, %v1375_v57  ;;  %v1448_v57 = vunpack.c.l.s4 %v1991_v56 }
0x11ff   : > { %v1379_v58 = vshrl.u32 %v1377_v47, 16  ;;  %v1378_v27 = vand.u32 65535, %v1377_v47  ;;  %v1449_v36 = vunpack.c.0.s8 %v1448_v57 }
0x1201   : > { %v1381_v60 = vcvt.s32.f32 %v1379_v58  ;;  %v1380_v61 = vcvt.s32.f32 %v1378_v27  ;;  %v1452_v47 = vsub.s32 %v1449_v36, %v2214_v14  ;;  %v1488_v58 = vsel %vm277_vm1, %v2351_v35, 0.0  ;;  %v265_v14 = vld [vmem:[%s2181_s18 + $0x8] sm:$0xff] }
0x1203   : > { %1384 = vadd.xlane.f32.xlu0 %v1381_v60  ;;  %1382 = vadd.xlane.f32.xlu1 %v1380_v61  ;;  %v1490_v60 = vcombine.high %v1488_v58, %v1488_v58 }
0x1205   : > { %v1493_v35 = vsel %vm281_vm0, %v1490_v60, 0.0 }
0x128c   : > { %v1385_v62 = vpop.xlane.xlu0 %1384  ;;  %v1383_v34 = vpop.xlane.xlu1 %1382 }
0x128d   : > { %v1387_v39 = vcvt.f32.s32 %v1385_v62  ;;  %v1386_v12 = vcvt.f32.s32 %v1383_v34 }
0x128f   : > { %v1388_v4 = vshll.u32 %v1387_v39, 16 }
0x1291   : > { %v1389_v13 = vadd.s32 %v1388_v4, %v1386_v12  ;;  %v1492_v4 = vsel %vm281_vm0, %v1488_v58, 0.0  ;;  %v266_v12 = vld [vmem:[%s2181_s18 + $0x10] sm:$0xff] }
0x1293   : > { %vm1390_vm15 = vcmp.ge.s32.totalorder %v1389_v13, %v2371_v38  ;;  %v298_v13 = vand.u32 2147483647, %v265_v14 }
0x1294   : > { %v1391_v7 = vsel %vm1390_vm15, %v1370_v55, %v1369_v31 }
0x1295   : > { %v1392_v18 = vor.u32 2, %v1391_v7  ;;  %vm2610_vm13 = vcmp.lt.f32.partialorder %v298_v13, 1.0 }
0x1297   : > { %vm1393_vm2 = vcmp.ge.s32.totalorder %v2356_v33, %v1392_v18  ;;  %vm1394_vm3 = vcmp.ge.s32.totalorder %v2360_v15, %v1392_v18 }
0x1298   : > { %v1395_v9 = vsel %vm1393_vm2, 1, %v1989_v1  ;;  %v1396_v16 = vsel %vm1394_vm3, 1, %v1989_v1 }
0x1299   : > { %v1397_v29 = vsel %vm281_vm0, %v1395_v9, 0  ;;  %v1398_v17 = vsel %vm281_vm0, %v1396_v16, 0  ;;  %v264_v16 = vld [vmem:[%s2181_s18] sm:$0xff] }
0x129a   : > { %v1399_v21 = vadd.s32 %v1398_v17, %v1397_v29  ;;  %v267_v29 = vld [vmem:[%s2181_s18 + $0x18] sm:$0xff]  ;;  %v299_v17 = vand.u32 2147483647, %v266_v12 }
0x129c   : > { %v1401_v22 = vshrl.u32 %v1399_v21, 16  ;;  %v1400_v28 = vand.u32 65535, %v1399_v21  ;;  %v297_v21 = vand.u32 2147483647, %v264_v16  ;;  %vm2614_vm15 = vcmp.lt.f32.partialorder %v299_v17, 1.0 }
0x129e   : > { %v1403_v37 = vcvt.s32.f32 %v1401_v22  ;;  %v1402_v6 = vcvt.s32.f32 %v1400_v28  ;;  %v300_v22 = vand.u32 2147483647, %v267_v29  ;;  %vm2618_vm2 = vcmp.lt.f32.partialorder %v297_v21, 1.0 }
0x12a0   : > { %1406 = vadd.xlane.f32.xlu0 %v1403_v37  ;;  %1404 = vadd.xlane.f32.xlu1 %v1402_v6  ;;  %v305_v37 = vmul.f32 0.5, %v264_v16  ;;  %v307_v6 = vmul.f32 0.5, %v266_v12  ;;  %vm2622_vm3 = vcmp.lt.f32.partialorder %v300_v22, 1.0 }
0x1329   : > { %v1407_v40 = vpop.xlane.xlu0 %1406  ;;  %v1405_v41 = vpop.xlane.xlu1 %1404 }
0x132a   : > { %v1409_v32 = vcvt.f32.s32 %v1407_v40  ;;  %v1408_v63 = vcvt.f32.s32 %v1405_v41  ;;  %v308_v40 = vmul.f32 0.5, %v267_v29 }
0x132c   : > { %v1410_v51 = vshll.u32 %v1409_v32, 16 }
0x132e   : > { %v1411_v23 = vadd.s32 %v1410_v51, %v1408_v63 }
0x1330   : > { %vm1412_vm4 = vcmp.ge.s32.totalorder %v1411_v23, %v2371_v38 }
0x1331   : > { %v1413_v52 = vsel %vm1412_vm4, %v1392_v18, %v1391_v7  ;;  %v306_v7 = vmul.f32 0.5, %v265_v14 }
0x1332   : > { %v1414_v42 = vor.u32 1, %v1413_v52 }
0x1333   : > { %v310_v63 = vmul.f32 %v306_v7, %v265_v14 }
0x1334   : > { %vm1415_vm5 = vcmp.ge.s32.totalorder %v2356_v33, %v1414_v42  ;;  %vm1416_vm6 = vcmp.ge.s32.totalorder %v2360_v15, %v1414_v42 }
0x1335   : > { %v1417_v43 = vsel %vm1415_vm5, 1, %v1989_v1  ;;  %v1418_v59 = vsel %vm1416_vm6, 1, %v1989_v1 }
0x1336   : > { %v1419_v44 = vsel %vm281_vm0, %v1417_v43, 0  ;;  %v1420_v45 = vsel %vm281_vm0, %v1418_v59, 0  ;;  %v311_v43 = vmul.f32 %v307_v6, %v266_v12 }
0x1337   : > { %v1421_v2 = vadd.s32 %v1420_v45, %v1419_v44  ;;  %v312_v45 = vmul.f32 %v308_v40, %v267_v29 }
0x1339   : > { %v1423_v3 = vshrl.u32 %v1421_v2, 16  ;;  %v1422_v30 = vand.u32 65535, %v1421_v2  ;;  %v1714_v2 = vadd.f32 -0.5, %v297_v21 }
0x133b   : > { %v1425_v20 = vcvt.s32.f32 %v1423_v3  ;;  %v1424_v46 = vcvt.s32.f32 %v1422_v30  ;;  %v1715_v30 = vadd.f32 -0.5, %v298_v13 }
0x133d   : > { %1428 = vadd.xlane.f32.xlu0 %v1425_v20  ;;  %1426 = vadd.xlane.f32.xlu1 %v1424_v46  ;;  %v1716_v20 = vadd.f32 -0.5, %v299_v17  ;;  %v1717_v46 = vadd.f32 -0.5, %v300_v22 }
0x13c6   : > { %v1429_v48 = vpop.xlane.xlu0 %1428  ;;  %v1427_v49 = vpop.xlane.xlu1 %1426 }
0x13c7   : > { %v1431_v11 = vcvt.f32.s32 %v1429_v48  ;;  %v1430_v53 = vcvt.f32.s32 %v1427_v49  ;;  %v1992_v48 = vmov 0.0  }
0x13c8   : > { %v2629_v49 = vsel %vm277_vm1, 1.0, %v1992_v48  ;;  %vm1486_vm1 = vcmp.gt.s32.totalorder %v2371_v38, 0 }
0x13c9   : > { %v1432_v50 = vshll.u32 %v1431_v11, 16 }
0x13cb   : > { %v1433_v54 = vadd.s32 %v1432_v50, %v1430_v53  ;;  %v1494_v50 = vadd.f32 %v1493_v35, %v1492_v4 }
0x13cd   : > { %vm1434_vm7 = vcmp.ge.s32.totalorder %v1433_v54, %v2371_v38  ;;  %v318_v54 = vsel %vm2610_vm13, %v310_v63, %v1715_v30 }
0x13ce   : > { %v1435_v24 = vsel %vm1434_vm7, %v1414_v42, %v1413_v52  ;;  %v309_v42 = vmul.f32 %v305_v37, %v264_v16  ;;  %v326_v0 = vcombine.high %v318_v54, %v318_v54  ;;  %v347_v36 = vsel %vm281_vm0, %v318_v54, 0.0 }
0x13cf   : > { %vm1436_vm8 = vcmp.eq.s32.totalorder %v2356_v33, %v1435_v24  ;;  %vm1437_vm9 = vcmp.eq.s32.totalorder %v2360_v15, %v1435_v24  ;;  %v319_v24 = vsel %vm2614_vm15, %v311_v43, %v1716_v20 }
0x13d0   : > { %v1439_v25 = vsel %vm1436_vm8, %v2356_v33, 0.0  ;;  %v1440_v5 = vsel %vm1437_vm9, %v2360_v15, 0.0  ;;  %v317_v53 = vsel %vm2618_vm2, %v309_v42, %v1714_v2  ;;  %v354_v60 = vsel %vm281_vm0, %v326_v0, 0.0 }
0x13d1   : > { %v1441_v31 = vsel %vm281_vm0, %v1439_v25, -inf  ;;  %v1442_v55 = vsel %vm281_vm0, %v1440_v5, -inf  ;;  %v320_v25 = vsel %vm2622_vm3, %v312_v45, %v1717_v46  ;;  %v325_v5 = vcombine.high %v317_v53, %v317_v53 }
0x13d2   : > { %v1443_v26 = vmax.f32 %v1441_v31, %v1442_v55  ;;  %v327_v31 = vcombine.high %v319_v24, %v319_v24  ;;  %v328_v55 = vcombine.high %v320_v25, %v320_v25  ;;  %v375_v14 = vsel %vm281_vm0, %v320_v25, 0.0 }
0x13d3   : > { %v340_v57 = vsel %vm281_vm0, %v325_v5, 0.0  ;;  %v391_v5 = vrot.slane %v2629_v49, 1  ;;  %v393_v0 = vrot.slane %v2629_v49, 2 }
0x13d4   : > { %1444 = vmax.xlane.f32.xlu0 %v1443_v26  ;;  %v333_v26 = vsel %vm281_vm0, %v317_v53, 0.0  ;;  %v341_v58 = vrot.slane %v340_v57, 4  ;;  %v382_v16 = vsel %vm281_vm0, %v328_v55, 0.0 }
0x13d5   : > { %v334_v56 = vrot.slane %v333_v26, 4  ;;  %v383_v37 = vrot.slane %v382_v16, 4 }
0x13d6   : > { %v342_v4 = vadd.f32 %v341_v58, %v340_v57 }
0x13d7   : > { %v384_v52 = vadd.f32 %v383_v37, %v382_v16 }
0x13d8   : > { %v343_v29 = vrot.slane %v342_v4, 2 }
0x13d9   : > { %v385_v30 = vrot.slane %v384_v52, 2 }
0x13da   : > { %v344_v6 = vadd.f32 %v343_v29, %v342_v4 }
0x13db   : > { %v386_v54 = vadd.f32 %v385_v30, %v384_v52 }
0x13dc   : > { %v345_v42 = vrot.slane %v344_v6, 1 }
0x13de   : > { %v346_v20 = vadd.f32 %v345_v42, %v344_v6 }
0x145d   : > { %v2595_v27 = vpop.xlane.xlu0 %1444 }
0x145e   : > { %v1453_v15 = vrot.slane %v2595_v27, %v1452_v47  ;;  %v361_v47 = vsel %vm281_vm0, %v319_v24, 0.0  ;;  %v390_v24 = vcombine.high %v2629_v49, %v2629_v49 }
0x1460   : > { %vm1455_vm11 = vcmp.gt.f32.partialorder %v2356_v33, %v1453_v15  ;;  %v348_v15 = vrot.slane %v347_v36, 4  ;;  %v394_v57 = vrot.slane %v390_v24, 2  ;;  %v406_v58 = vmul.f32 %v390_v24, %v346_v20 }
0x1461   : > { %v1456_v61 = vsel %vm1455_vm11, 1, %v1989_v1  ;;  %v1473_v62 = vsel %vm1455_vm11, %v2356_v33, 0.0 }
0x1462   : > { %v1457_v34 = vcombine.high %v1456_v61, %v1456_v61  ;;  %v1475_v39 = vcombine.high %v1473_v62, %v1473_v62  ;;  %v1458_v18 = vsel %vm281_vm0, %v1456_v61, 0  ;;  %v1477_v3 = vsel %vm281_vm0, %v1473_v62, 0.0 }
0x1463   : > { %v362_v61 = vrot.slane %v361_v47, 4  ;;  %v335_v62 = vadd.f32 %v334_v56, %v333_v26  ;;  %v349_v35 = vadd.f32 %v348_v15, %v347_v36  ;;  %v387_v26 = vrot.slane %v386_v54, 1 }
0x1464   : > { %v1459_v9 = vsel %vm281_vm0, %v1457_v34, 0  ;;  %v1478_v33 = vsel %vm281_vm0, %v1475_v39, 0.0  ;;  %v355_v34 = vrot.slane %v354_v60, 4  ;;  %v368_v39 = vsel %vm281_vm0, %v327_v31, 0.0 }
0x1465   : > { %v1460_v1 = vadd.s32 %v1459_v9, %v1458_v18  ;;  %v1479_v11 = vadd.f32 %v1478_v33, %v1477_v3  ;;  %v363_v12 = vadd.f32 %v362_v61, %v361_v47  ;;  %v369_v13 = vrot.slane %v368_v39, 4 }
0x1466   : > { %v336_v7 = vrot.slane %v335_v62, 2  ;;  %v356_v18 = vadd.f32 %v355_v34, %v354_v60  ;;  %v376_v9 = vrot.slane %v375_v14, 4  ;;  %v350_v17 = vrot.slane %v349_v35, 2 }
0x1467   : > { %v1462_v41 = vshrl.u32 %v1460_v1, 16  ;;  %v1461_v32 = vand.u32 65535, %v1460_v1  ;;  %v364_v1 = vrot.slane %v363_v12, 2  ;;  %v370_v33 = vadd.f32 %v369_v13, %v368_v39 }
0x1468   : > { %v337_v21 = vadd.f32 %v336_v7, %v335_v62  ;;  %v357_v22 = vrot.slane %v356_v18, 2  ;;  %v377_v28 = vadd.f32 %v376_v9, %v375_v14  ;;  %v351_v40 = vadd.f32 %v350_v17, %v349_v35 }
0x1469   : > { %v1464_v59 = vcvt.s32.f32 %v1462_v41  ;;  %v1463_v44 = vcvt.s32.f32 %v1461_v32  ;;  %v365_v41 = vadd.f32 %v364_v1, %v363_v12  ;;  %v371_v32 = vrot.slane %v370_v33, 2 }
0x146a   : > { %v338_v51 = vrot.slane %v337_v21, 1  ;;  %v358_v63 = vadd.f32 %v357_v22, %v356_v18  ;;  %v378_v23 = vrot.slane %v377_v28, 2  ;;  %v352_v43 = vrot.slane %v351_v40, 1 }
0x146b   : > { %1467 = vadd.xlane.f32.xlu1 %v1464_v59  ;;  %1465 = vadd.xlane.f32.xlu0 %v1463_v44  ;;  %v366_v59 = vrot.slane %v365_v41, 1  ;;  %v372_v44 = vadd.f32 %v371_v32, %v370_v33  ;;  %v395_v31 = vrot.slane %v2629_v49, 3  ;;  %v392_v56 = vrot.slane %v390_v24, 1 }
0x146c   : > { %v339_v45 = vadd.f32 %v338_v51, %v337_v21  ;;  %v359_v2 = vrot.slane %v358_v63, 1  ;;  %v379_v3 = vadd.f32 %v378_v23, %v377_v28  ;;  %v353_v46 = vadd.f32 %v352_v43, %v351_v40 }
0x146d   : > { %v367_v48 = vadd.f32 %v366_v59, %v365_v41  ;;  %v396_v36 = vrot.slane %v390_v24, 3  ;;  %v388_v60 = vadd.f32 %v387_v26, %v386_v54 }
0x146e   : > { %v380_v53 = vrot.slane %v379_v3, 1  ;;  %v405_v47 = vmul.f32 %v2629_v49, %v339_v45  ;;  %v407_v15 = vmul.f32 %v391_v5, %v353_v46 }
0x146f   : > { %1480 = vadd.xlane.f32.xlu1 %v1479_v11  ;;  %1495 = vadd.xlane.f32.xlu0 %v1494_v50  ;;  %v373_v11 = vrot.slane %v372_v44, 1  ;;  %v360_v50 = vadd.f32 %v359_v2, %v358_v63  ;;  %v409_v62 = vmul.f32 %v393_v0, %v367_v48  ;;  %v412_v4 = vmul.f32 %v396_v36, %v388_v60 }
0x1470   : > { %v381_v55 = vadd.f32 %v380_v53, %v379_v3  ;;  %v421_v14 = vrot.slane %v407_v15, 7 }
0x1471   : > { %v374_v25 = vadd.f32 %v373_v11, %v372_v44  ;;  %v408_v61 = vmul.f32 %v392_v56, %v360_v50  ;;  %v424_v35 = vrot.slane %v409_v62, 6  ;;  %v434_v49 = vrot.slane %v412_v4, 5 }
0x1472   : > { %v411_v39 = vmul.f32 %v395_v31, %v381_v55  ;;  %v423_v7 = vsel %vm422_vm10, %v421_v14, %v405_v47 }
0x1473   : > { %v410_v34 = vmul.f32 %v394_v57, %v374_v25  ;;  %v430_v12 = vrot.slane %v408_v61, 7  ;;  %v426_v9 = vsel %vm425_vm12, %v424_v35, %v423_v7 }
0x1474   : > { %v427_v18 = vrot.slane %v411_v39, 5 }
0x1475   : > { %v432_v13 = vrot.slane %v410_v34, 6  ;;  %v431_v16 = vsel %vm422_vm10, %v430_v12, %v406_v58  ;;  %vm1498_vm10 = vcmask 3072  }
0x1476   : > { %v429_v29 = vsel %vm428_vm14, %v427_v18, %v426_v9 }
0x1477   : > { %v433_v17 = vsel %vm425_vm12, %v432_v13, %v431_v16  ;;  %v438_v33 = vsel %vm281_vm0, %v429_v29, 0.0 }
0x1478   : > { %v435_v1 = vsel %vm428_vm14, %v434_v49, %v433_v17 }
0x1479   : > { %v439_v21 = vsel %vm281_vm0, %v435_v1, 0.0 }
0x147a   : > { %v440_v22 = vadd.f32 %v439_v21, %v438_v33 }
0x147c   : > { %441 = vadd.xlane.f32.xlu1 %v440_v22 }
0x14f4   : > { %v1468_v28 = vpop.xlane.xlu1 %1467  ;;  %v1466_v37 = vpop.xlane.xlu0 %1465 }
0x14f5   : > { %v1470_v6 = vcvt.f32.s32 %v1468_v28  ;;  %v1469_v41 = vcvt.f32.s32 %v1466_v37 }
0x14f7   : > { %v1471_v40 = vshll.u32 %v1470_v6, 16 }
0x14f8   : > { %v1481_v52 = vpop.xlane.xlu1 %1480  ;;  %v1496_v43 = vpop.xlane.xlu0 %1495 }
0x14f9   : > { %v1472_v32 = vadd.s32 %v1471_v40, %v1469_v41 }
0x14fb   : > { %v1482_v51 = vsub.s32 %v2371_v38, %v1472_v32 }
0x14fd   : > { %v1483_v63 = vcvt.s32.f32 %v1482_v51 }
0x14ff   : > { %v1484_v23 = vmul.f32 %v1483_v63, %v2595_v27  ;;  %v1509_v27 = vsel %vm281_vm0, %v2368_v10, 0  ;;  %vm1566_vm0 = vcmp.lt.s32.totalorder %v450_v8, 384 }
0x1500   : > { %v1510_v50 = vrot.slane %v1509_v27, 4 }
0x1501   : > { %v1485_v42 = vadd.f32 %v1484_v23, %v1481_v52 }
0x1502   : > { %v1511_v53 = vadd.s32 %v1510_v50, %v1509_v27 }
0x1503   : > { %v1487_v59 = vsel %vm1486_vm1, %v1485_v42, 0.0 }
0x1504   : > { %v1497_v44 = vadd.f32 %v1496_v43, %v1487_v59  ;;  %v1512_v54 = vrot.slane %v1511_v53, 2 }
0x1505   : > { %v442_v2 = vpop.xlane.xlu1 %441 }
0x1506   : > { %v1499_v45 = vsel %vm1498_vm10, %v1497_v44, 0.0  ;;  %v443_v3 = vrot.slane %v442_v2, 4  ;;  %v1513_v5 = vadd.s32 %v1512_v54, %v1511_v53 }
0x1507   : > { %1500 = vadd.xlane.f32.xlu0 %v1499_v45 }
0x1508   : > { %v444_v30 = vadd.f32 %v443_v3, %v442_v2  ;;  %v1514_v55 = vrot.slane %v1513_v5, 1 }
0x150a   : > { %v445_v20 = vrot.slane %v444_v30, 2  ;;  %v1515_v57 = vadd.s32 %v1514_v55, %v1513_v5 }
0x150c   : > { %v446_v46 = vadd.f32 %v445_v20, %v444_v30 }
0x150e   : > { %v447_v48 = vrot.slane %v446_v46, 1 }
0x1510   : > { %v448_v11 = vadd.f32 %v447_v48, %v446_v46 }
0x1512   : > { %1725 = vpush %v448_v11 }
0x1543   : > { %s1726_s22 = spop %1725 }
0x1544   : > { %v1528_v10 = vstv %s1726_s22 }
0x1590   : > { %v1501_v38 = vpop.xlane.xlu0 %1500 }
0x1591   : > { %v1502_v24 = vrot.slane %v1501_v38, 4 }
0x1593   : > { %v1503_v25 = vadd.f32 %v1502_v24, %v1501_v38 }
0x1595   : > { %v1504_v0 = vrot.slane %v1503_v25, 2 }
0x1597   : > { %v1505_v31 = vadd.f32 %v1504_v0, %v1503_v25 }
0x1599   : > { %v1506_v26 = vrot.slane %v1505_v31, 1 }
0x159b   : > { %v1507_v56 = vadd.f32 %v1506_v26, %v1505_v31 }
0x159d   : > { %1727 = vpush %v1507_v56 }
0x159e   : > { %1729 = vpush %v1515_v57 }
0x15ce   : > { %s1728_s17 = spop %1727 }
0x15cf   : > { %v1533_v36 = vstv %s1728_s17  ;;  %s1730_s28 = spop %1729 }
0x15d0   : > { %v1540_v47 = vcombine.low %v1533_v36, %v1528_v10  ;;  %s1517_s29 = scvt.s32.f32 %s1730_s28 }
0x15d2   : > { %v1547_v58 = vrot.slane %v1540_v47, %v2222_v19  ;;  %v1529_v15 = vstv %s1517_s29 }
0x15d3   : > { %v1554_v60 = vrot.slane %v1529_v15, %v2222_v19 }
0x15d5   : > { %v1555_v61 = vcombine.low %v1547_v58, %v1554_v60 }
0x15d7   : > { %v1562_v62 = vrot.slane %v1555_v61, %v2222_v19 }
0x15d9   : > { %1568 = vst.msk [vmem:[%s263_s6] sm:$0x7] %vm1566_vm0, %v1562_v62 }
0x15da   : > { %1925 = shalt.err (!%p1922_p11)
}
0x15db   : > { %s1926_s18 = scalar_lea.hbm %s1582_s30, 48  ;;  %s1930_s26 = scalar_lea.hbm %s2709_s3, 96 }
0x15dc   : > { %p1927_p12 = scmp.ne.s32.totalorder %s1582_s30, %s1926_s18  ;;  %p1931_p4 = scmp.lt.s32.totalorder %s1582_s30, %s2709_s3 }
0x15dd   : > { %p1932_p5 = scmp.lt.s32.totalorder %s1930_s26, %s1926_s18 }
0x15de   : > { %p1928_p0 = pnand %p1927_p12, %p2739_p7 }
0x15df   : > { %p1933_p2 = por %p1932_p5, %p1931_p4 }
0x15e0   : > { %p1929_p6 = pneg %p1928_p0 }
0x15e2   : > { %p1934_p13 = pnand %p1933_p2, %p1929_p6 }
0x15e4   : > { %1937 = shalt.err (!%p1934_p13)
}
0x15e5   : > { %1738 = dma.vmem_to_hbm [thread:$0]  (%p2739_p7), %s1585_s9, 48, %s1582_s30, %s1570_s5  }
0x15e6 PF: > { %s1596_s19 = sand.u32 1, %s1968_s12   ;;  %p2740_p8 = scmp.ne.s32.totalorder %s2722_s24, 0 }
0x15e7   : > { %p2741_p10 = scmp.ge.s32.totalorder %s1980_s15, 2  ;;  %s1597_s4 = scalar_lea.sflag [#allocation4], %s1596_s19 }
0x15e9   : > { %p1751_p1 = pnand %p2741_p10, %p2740_p8 }
0x15eb   : > { %p1752_p3 = pneg %p1751_p1 }
0x15ed   : > { %1963 = dma.done.wait (%p1752_p3), %s1597_s4, 48  }
0x15ee   : > { %1965 = vsyncadd (%p1752_p3), %s1597_s4, 4294967248  ;;  %s2742_s15 = sld [smem:[#allocation13_spill]]  ;;  %s2745_s12 = smov %s1972_s13 }
0x15ef   : > { %s2743_s22 = sld [smem:[#allocation12_spill]] }
0x15f0   : > { %s2744_s14 = sld [smem:[#allocation14_spill]] }
0x15f4   : > { %p19_p9 = scmp.ge.s32.totalorder %s2742_s15, 4  }
0x15f5   : > { %s2746_s13 = smov %s2743_s22 }
0x15f6   :  { %21 = sbr.rel (!%p19_p9) target bundleno = 10 (0xa), region = 101 }
0x15fb   :  { %1602 = vsyncpa [#allocation3], 1 }
0x15fc   :  { %1604 = vsyncpa [#allocation3 + $0x1], 1 }
0x15fd   :  { %1605 = vsyncpa [#allocation6], 1 }
0x15fe   :  { %1607 = vsyncpa [#allocation6 + $0x1], 1 }
0x15ff   :  { %1608 = vsyncpa [#allocation4], 1 }
0x1600   :  { %1610 = vsyncpa [#allocation4 + $0x1], 1 }

</bundles_post_ra>
